<compile_context>
chip_gen: v7x
topology: tpu7x:2x2x1
jax: 0.10.0
libtpu: 0.0.40
codegen_flags: <defaults>
</compile_context>

<pallas_src>
import functools

import jax
import jax.numpy as jnp
from jax.experimental import pallas as pl
from jax.experimental.pallas import tpu as pltpu


def _round_up(x, m):
    return ((x + m - 1) // m) * m


# ----------------------------------------------------------------------------
# Fused linear-chain kernel (row-tiled, bf16 MXU operands, f32 accumulation)
# ----------------------------------------------------------------------------
def _apply_act(y, act):
    if act == "relu":
        return jnp.maximum(y, 0.0)
    if act == "log_softmax":
        y = y - jnp.max(y, axis=-1, keepdims=True)
        return y - jnp.log(jnp.sum(jnp.exp(y), axis=-1, keepdims=True))
    return y  # "none"


def _chain_kernel(*refs, acts, has_add, post_act):
    x_ref = refs[0]
    pos = 1
    add_ref = None
    if has_add:
        add_ref = refs[pos]
        pos += 1
    n_layers = len(acts)
    wb_refs = refs[pos:pos + 2 * n_layers]
    o_ref = refs[pos + 2 * n_layers]

    y = x_ref[...].astype(jnp.float32)
    for li in range(n_layers):
        w = wb_refs[2 * li][...]                      # bf16 [K_i, K_{i+1}]
        b = wb_refs[2 * li + 1][...]                  # f32  [1, K_{i+1}]
        y = jnp.dot(y.astype(jnp.bfloat16), w,
                    preferred_element_type=jnp.float32) + b
        y = _apply_act(y, acts[li])
    if add_ref is not None:
        y = _apply_act(y + add_ref[...].astype(jnp.float32), post_act)
    o_ref[...] = y.astype(o_ref.dtype)


def fused_linear_chain(x, layers, acts, add=None, post_act="none",
                       row_block=256):
    """y = act_n(... act_0(x @ W0 + b0) ...); optionally post_act(y + add).

    Single pallas_call, tiled over rows (grid axis "parallel"), weights resident
    in VMEM, bf16 MXU operands, f32 accumulation / elementwise.
    """
    M, K = x.shape
    n_out = layers[-1][0].shape[1]
    if M <= row_block:
        tm = _round_up(max(M, 8), 8)
    else:
        tm = row_block
    m_pad = _round_up(M, tm)

    def pad_rows(a):
        return jnp.pad(a, ((0, m_pad - M), (0, 0)))

    inputs = [pad_rows(x).astype(jnp.bfloat16)]
    in_specs = [pl.BlockSpec((tm, K), lambda i: (i, 0))]
    if add is not None:
        inputs.append(pad_rows(add).astype(jnp.float32))
        in_specs.append(pl.BlockSpec((tm, add.shape[1]), lambda i: (i, 0)))
    for (w, b) in layers:
        inputs.append(w.astype(jnp.bfloat16))
        in_specs.append(pl.BlockSpec(w.shape, lambda i: (0, 0)))
        b2 = b.reshape(1, -1).astype(jnp.float32)
        inputs.append(b2)
        in_specs.append(pl.BlockSpec(b2.shape, lambda i: (0, 0)))

    out = pl.pallas_call(
        functools.partial(_chain_kernel, acts=tuple(acts),
                          has_add=add is not None, post_act=post_act),
        grid=(m_pad // tm,),
        in_specs=in_specs,
        out_specs=pl.BlockSpec((tm, n_out), lambda i: (i, 0)),
        out_shape=jax.ShapeDtypeStruct((m_pad, n_out), jnp.float32),
        compiler_params=pltpu.CompilerParams(
            dimension_semantics=("parallel",)),
    )(*inputs)
    return out[:M]


# ----------------------------------------------------------------------------
# Flash-style dense-masked GAT attention kernel (online softmax over k blocks)
# ----------------------------------------------------------------------------
def _gat_flash_kernel(ad_ref, as_ref, adj_ref, xp_ref, b_ref, o_ref,
                      m_sc, l_sc, acc_sc):
    ki = pl.program_id(2)

    @pl.when(ki == 0)
    def _():
        m_sc[...] = jnp.full_like(m_sc, -1e30)
        l_sc[...] = jnp.zeros_like(l_sc)
        acc_sc[...] = jnp.zeros_like(acc_sc)

    s = ad_ref[...] + as_ref[...]                       # [1, bq, bk] f32
    s = jnp.where(s >= 0.0, s, 0.2 * s)                 # LeakyReLU(0.2)
    m = adj_ref[...].astype(jnp.float32)                # bf16 0/1 mask -> f32
    s = jnp.where(m > 0.0, s, -1e30)                    # single mask application

    m_prev = m_sc[...]
    m_new = jnp.maximum(m_prev, jnp.max(s, axis=-1, keepdims=True))
    alpha = jnp.exp(m_prev - m_new)
    p = jnp.exp(s - m_new)                              # f32
    l_sc[...] = alpha * l_sc[...] + jnp.sum(p, axis=-1, keepdims=True)
    acc_sc[...] = alpha * acc_sc[...] + jnp.einsum(
        "bqk,bkc->bqc", p.astype(jnp.bfloat16), xp_ref[...],
        preferred_element_type=jnp.float32)
    m_sc[...] = m_new

    @pl.when(ki == pl.num_programs(2) - 1)
    def _():
        inv = pl.reciprocal(jnp.maximum(l_sc[...], 1e-12), approx=True)
        o_ref[...] = jnp.maximum(acc_sc[...] * inv + b_ref[...], 0.0)


def gat_attention(a_dst, a_src, adj, xp_h, bias):
    """Dense-masked multi-head GAT: out = relu(softmax_j(leaky(ad_i+as_j)) @ xp + b).

    a_dst/a_src: [N, H] f32, adj: [N, N] 0/1, xp_h: [N, H, C], bias: [H*C].
    Flash-tiled over (head, q_block, k_block); returns [N, H*C] f32.
    """
    N, H = a_dst.shape
    C = xp_h.shape[-1]
    n_pad = _round_up(max(N, 128), 128)
    blk = 256 if n_pad % 256 == 0 else 128
    bq = bk = blk

    def pad_n(a, axis):
        pads = [(0, 0)] * a.ndim
        pads[axis] = (0, n_pad - N)
        return jnp.pad(a, pads)

    ad = pad_n(a_dst, 0).T[:, :, None].astype(jnp.float32)      # [H, n_pad, 1]
    asr = pad_n(a_src, 0).T[:, None, :].astype(jnp.float32)     # [H, 1, n_pad]
    adjp = pad_n(pad_n(adj, 0), 1)[None].astype(jnp.bfloat16)   # [1, n_pad, n_pad]
    xpp = jnp.transpose(pad_n(xp_h, 0), (1, 0, 2)).astype(jnp.bfloat16)  # [H,n_pad,C]
    biasr = bias.reshape(H, 1, C).astype(jnp.float32)

    out = pl.pallas_call(
        _gat_flash_kernel,
        grid=(H, n_pad // bq, n_pad // bk),
        in_specs=[
            pl.BlockSpec((1, bq, 1), lambda h, i, j: (h, i, 0)),
            pl.BlockSpec((1, 1, bk), lambda h, i, j: (h, 0, j)),
            pl.BlockSpec((1, bq, bk), lambda h, i, j: (0, i, j)),
            pl.BlockSpec((1, bk, C), lambda h, i, j: (h, j, 0)),
            pl.BlockSpec((1, 1, C), lambda h, i, j: (h, 0, 0)),
        ],
        out_specs=pl.BlockSpec((1, bq, C), lambda h, i, j: (h, i, 0)),
        out_shape=jax.ShapeDtypeStruct((H, n_pad, C), jnp.float32),
        scratch_shapes=[pltpu.VMEM((1, bq, 1), jnp.float32),
                        pltpu.VMEM((1, bq, 1), jnp.float32),
                        pltpu.VMEM((1, bq, C), jnp.float32)],
        compiler_params=pltpu.CompilerParams(
            dimension_semantics=("parallel", "parallel", "arbitrary")),
    )(ad, asr, adjp, xpp, biasr)

    return jnp.transpose(out[:, :N, :], (1, 0, 2)).reshape(N, H * C)


# ----------------------------------------------------------------------------
# Vectorized graph glue: top-k node selection and masked global pools
# ----------------------------------------------------------------------------
def topk_mask(score, batch, node_mask, ratio, num_graphs):
    """Keep the ceil(ratio * n_live_g) highest-scoring live nodes of each graph."""
    n = score.shape[0]
    live = node_mask
    s_eff = jnp.where(live, score, -2.0)          # live scores are tanh in (-1,1)
    order = jnp.lexsort((-s_eff, batch))          # by graph, then score desc
    pos = jnp.zeros((n,), jnp.int32).at[order].set(jnp.arange(n, dtype=jnp.int32))
    cnt_all = jax.ops.segment_sum(jnp.ones((n,), jnp.int32), batch,
                                  num_segments=num_graphs)
    start = jnp.cumsum(cnt_all) - cnt_all
    rank = pos - start[batch]
    n_live = jax.ops.segment_sum(live.astype(jnp.int32), batch,
                                 num_segments=num_graphs)
    k = jnp.ceil(ratio * n_live.astype(jnp.float32)).astype(jnp.int32)
    return live & (rank < k[batch])


def masked_global_pools(x, batch, node_mask, num_graphs):
    """[global_max_pool, global_mean_pool] concatenated per graph -> [B, 2F]."""
    live = node_mask
    xm = jnp.where(live[:, None], x, -jnp.inf)
    gmax = jax.ops.segment_max(xm, batch, num_segments=num_graphs)
    gmax = jnp.where(jnp.isfinite(gmax), gmax, 0.0)
    xs = jnp.where(live[:, None], x, 0.0)
    gsum = jax.ops.segment_sum(xs, batch, num_segments=num_graphs)
    cnt = jax.ops.segment_sum(live.astype(x.dtype), batch,
                              num_segments=num_graphs)
    gmean = gsum / jnp.maximum(cnt, 1.0)[:, None]
    return jnp.concatenate([gmax, gmean], axis=1)


# ----------------------------------------------------------------------------
# Model forward
# ----------------------------------------------------------------------------
@functools.partial(jax.jit, static_argnames=("num_graphs",))
def net_forward(params, x, edge_index, edge_attr, batch, num_graphs):
    f32 = jnp.float32
    N = x.shape[0]
    src = edge_index[0]
    dst = edge_index[1]

    # Edge decoder + GINE message, one fused edge-row-tiled kernel:
    #   msg_e = relu( x[src_e] + relu(dec2(relu(dec1(edge_attr_e)))) )
    x_src = x[src].astype(f32)                                      # [E, 32] gather
    msg = fused_linear_chain(
        edge_attr,
        layers=[(params["dec1_w"], params["dec1_b"]),
                (params["dec2_w"], params["dec2_b"])],
        acts=("relu", "relu"),
        add=x_src, post_act="relu")                                 # [E, 32]

    # Index-driven scatter-add of messages to destination nodes (no dense one-hot).
    agg = jax.ops.segment_sum(msg, dst, num_segments=N)             # [N, 32]

    # GINE node update + MLP(32->128->256) + outer ReLU, one fused kernel.
    pre = (1.0 + params["gine_eps"]) * x.astype(f32) + agg
    h = fused_linear_chain(
        pre,
        layers=[(params["mlp1_w"], params["mlp1_b"]),
                (params["mlp2_w"], params["mlp2_b"])],
        acts=("relu", "relu"))                                      # [N, 256]

    node_mask0 = jnp.ones((N,), dtype=bool)

    # TopKPooling 1 (ratio=0.8): score = tanh(x.w / ||w||) (VPU reduction, no
    # lane-1 matmul output).
    w1 = params["pool1_w"]
    s1 = jnp.tanh(h @ (w1 / jnp.linalg.norm(w1)))                   # [N]
    node_mask1 = topk_mask(s1, batch, node_mask0, 0.8, num_graphs)
    h1 = jnp.where(node_mask1[:, None], h * s1[:, None], 0.0)       # [N, 256]

    x1 = masked_global_pools(h1, batch, node_mask1, num_graphs)     # [B, 512]

    # GATConv(256 -> 64, heads=4) on the pooled graph (with self loops).
    H_, C_ = 4, 64
    xp = fused_linear_chain(
        h1, layers=[(params["gat_w"], jnp.zeros((H_ * C_,), f32))],
        acts=("none",))                                             # [N, 256]
    xp_h = xp.reshape(N, H_, C_)
    a_src = jnp.einsum("nhc,hc->nh", xp_h, params["gat_att_src"])   # [N, 4]
    a_dst = jnp.einsum("nhc,hc->nh", xp_h, params["gat_att_dst"])   # [N, 4]

    edge_keep = node_mask1[src] & node_mask1[dst]
    adj = jnp.zeros((N, N), f32).at[dst, src].max(edge_keep.astype(f32))
    adj = jnp.maximum(adj, jnp.diag(node_mask1.astype(f32)))        # self loops

    g = gat_attention(a_dst, a_src, adj, xp_h, params["gat_b"])     # [N, 256]

    # TopKPooling 2
    w2 = params["pool2_w"]
    s2 = jnp.tanh(g @ (w2 / jnp.linalg.norm(w2)))
    node_mask2 = topk_mask(s2, batch, node_mask1, 0.8, num_graphs)
    h2 = jnp.where(node_mask2[:, None], g * s2[:, None], 0.0)

    x2 = masked_global_pools(h2, batch, node_mask2, num_graphs)     # [B, 512]

    # Readout MLP (512 -> 128 -> 64 -> 2 with log_softmax), one fused kernel.
    # TODO(synk): dropout(p=0.2) implemented as inference-mode identity (eval semantics).
    z = x1 + x2
    out = fused_linear_chain(
        z,
        layers=[(params["lin1_w"], params["lin1_b"]),
                (params["lin2_w"], params["lin2_b"]),
                (params["lin3_w"], params["lin3_b"])],
        acts=("relu", "relu", "log_softmax"))
    return out                                                       # [B, 2]


# ----------------------------------------------------------------------------
# Deterministic parameter init (weights stored as [in, out], i.e. W^T of torch)
# ----------------------------------------------------------------------------
def init_params(key):
    ks = jax.random.split(key, 20)

    def w(k, shape, scale=0.1):
        return scale * jax.random.normal(k, shape, dtype=jnp.float32)

    return {
        "dec1_w": w(ks[0], (100, 64)), "dec1_b": w(ks[1], (64,)),
        "dec2_w": w(ks[2], (64, 32)), "dec2_b": w(ks[3], (32,)),
        "mlp1_w": w(ks[4], (32, 128)), "mlp1_b": w(ks[5], (128,)),
        "mlp2_w": w(ks[6], (128, 256)), "mlp2_b": w(ks[7], (256,)),
        "gine_eps": jnp.float32(0.0),
        "pool1_w": w(ks[8], (256,)),
        "gat_w": w(ks[9], (256, 256)),
        "gat_att_src": w(ks[10], (4, 64)),
        "gat_att_dst": w(ks[11], (4, 64)),
        "gat_b": w(ks[12], (256,)),
        "pool2_w": w(ks[13], (256,)),
        "lin1_w": w(ks[14], (512, 128)), "lin1_b": w(ks[15], (128,)),
        "lin2_w": w(ks[16], (128, 64)), "lin2_b": w(ks[17], (64,)),
        "lin3_w": w(ks[18], (64, 2)), "lin3_b": w(ks[19], (2,)),
    }


if __name__ == "__main__":
    key = jax.random.PRNGKey(0)
    pkey, xkey, ekey = jax.random.split(key, 3)
    params = init_params(pkey)

    # Small synthetic batch of 2 ring graphs, 6 nodes each.
    num_graphs = 2
    nodes_per_graph = 6
    N = num_graphs * nodes_per_graph
    srcs, dsts = [], []
    for gph in range(num_graphs):
        base = gph * nodes_per_graph
        for i in range(nodes_per_graph):
            a_, b_ = base + i, base + (i + 1) % nodes_per_graph
            srcs += [a_, b_]
            dsts += [b_, a_]
    edge_index = jnp.array([srcs, dsts], dtype=jnp.int32)   # [2, 24]
    E = edge_index.shape[1]
    batch = jnp.repeat(jnp.arange(num_graphs, dtype=jnp.int32), nodes_per_graph)

    x = jax.random.normal(xkey, (N, 32), dtype=jnp.float32)           # node feats
    edge_attr = jax.random.normal(ekey, (E, 100), dtype=jnp.float32)  # edge feats

    out = net_forward(params, x, edge_index, edge_attr, batch, num_graphs)
    out = jax.block_until_ready(out)
    assert out.shape == (num_graphs, 2)
    assert bool(jnp.all(jnp.isfinite(out)))
    print("KERNEL_OK")
</pallas_src>

<mosaic_0001>
module attributes {stable_mosaic.version = 11 : i64} {
  func.func @_chain_kernel(%arg0: i32, %arg1: memref<24x100xbf16, #tpu.memory_space<vmem>>, %arg2: memref<24x32xf32, #tpu.memory_space<vmem>>, %arg3: memref<100x64xbf16, #tpu.memory_space<vmem>>, %arg4: memref<1x64xf32, #tpu.memory_space<vmem>>, %arg5: memref<64x32xbf16, #tpu.memory_space<vmem>>, %arg6: memref<1x32xf32, #tpu.memory_space<vmem>>, %arg7: memref<24x32xf32, #tpu.memory_space<vmem>>) attributes {dimension_semantics = [#tpu.dimension_semantics<parallel>], iteration_bounds = array<i64: 1>, scalar_prefetch = 0 : i64, scratch_operands = 0 : i64, tpu.core_type = #tpu.core_type<tc>, window_params = [{transform_indices = @transform_0, window_bounds = array<i64: 24, 100>}, {transform_indices = @transform_1, window_bounds = array<i64: 24, 32>}, {pipeline_mode = #tpu.pipeline_mode<synchronous>, transform_indices = @transform_2, window_bounds = array<i64: 100, 64>}, {pipeline_mode = #tpu.pipeline_mode<synchronous>, transform_indices = @transform_3, window_bounds = array<i64: 1, 64>}, {pipeline_mode = #tpu.pipeline_mode<synchronous>, transform_indices = @transform_4, window_bounds = array<i64: 64, 32>}, {pipeline_mode = #tpu.pipeline_mode<synchronous>, transform_indices = @transform_5, window_bounds = array<i64: 1, 32>}, {transform_indices = @transform_6, window_bounds = array<i64: 24, 32>}]} {
    %c0 = arith.constant 0 : index
    %c0_0 = arith.constant 0 : index
    %0 = vector.load %arg1[%c0, %c0_0] : memref<24x100xbf16, #tpu.memory_space<vmem>>, vector<24x100xbf16>
    %1 = arith.extf %0 : vector<24x100xbf16> to vector<24x100xf32>
    %c0_1 = arith.constant 0 : index
    %c0_2 = arith.constant 0 : index
    %2 = vector.load %arg3[%c0_1, %c0_2] : memref<100x64xbf16, #tpu.memory_space<vmem>>, vector<100x64xbf16>
    %c0_3 = arith.constant 0 : index
    %c0_4 = arith.constant 0 : index
    %3 = vector.load %arg4[%c0_3, %c0_4] : memref<1x64xf32, #tpu.memory_space<vmem>>, vector<1x64xf32>
    %4 = arith.truncf %1 : vector<24x100xf32> to vector<24x100xbf16>
    %cst = arith.constant dense<0.000000e+00> : vector<24x64xf32>
    %5 = tpu.matmul %4, %2, %cst {dimension_numbers = #tpu.dot_dimension_numbers<[1], [0], [0], [1], [0, 0, 1, 1], [], []>} : vector<24x100xbf16>, vector<100x64xbf16>, vector<24x64xf32> -> vector<24x64xf32>
    %6 = vector.broadcast %3 : vector<1x64xf32> to vector<24x64xf32>
    %7 = arith.addf %5, %6 : vector<24x64xf32>
    %cst_5 = arith.constant 0.000000e+00 : f32
    %8 = vector.broadcast %cst_5 : f32 to vector<24x64xf32>
    %9 = arith.maximumf %7, %8 : vector<24x64xf32>
    %c0_6 = arith.constant 0 : index
    %c0_7 = arith.constant 0 : index
    %10 = vector.load %arg5[%c0_6, %c0_7] : memref<64x32xbf16, #tpu.memory_space<vmem>>, vector<64x32xbf16>
    %c0_8 = arith.constant 0 : index
    %c0_9 = arith.constant 0 : index
    %11 = vector.load %arg6[%c0_8, %c0_9] : memref<1x32xf32, #tpu.memory_space<vmem>>, vector<1x32xf32>
    %12 = arith.truncf %9 : vector<24x64xf32> to vector<24x64xbf16>
    %cst_10 = arith.constant dense<0.000000e+00> : vector<24x32xf32>
    %13 = tpu.matmul %12, %10, %cst_10 {dimension_numbers = #tpu.dot_dimension_numbers<[1], [0], [0], [1], [0, 0, 1, 1], [], []>} : vector<24x64xbf16>, vector<64x32xbf16>, vector<24x32xf32> -> vector<24x32xf32>
    %14 = vector.broadcast %11 : vector<1x32xf32> to vector<24x32xf32>
    %15 = arith.addf %13, %14 : vector<24x32xf32>
    %cst_11 = arith.constant 0.000000e+00 : f32
    %16 = vector.broadcast %cst_11 : f32 to vector<24x32xf32>
    %17 = arith.maximumf %15, %16 : vector<24x32xf32>
    %c0_12 = arith.constant 0 : index
    %c0_13 = arith.constant 0 : index
    %18 = vector.load %arg2[%c0_12, %c0_13] : memref<24x32xf32, #tpu.memory_space<vmem>>, vector<24x32xf32>
    %19 = arith.addf %17, %18 : vector<24x32xf32>
    %cst_14 = arith.constant 0.000000e+00 : f32
    %20 = vector.broadcast %cst_14 : f32 to vector<24x32xf32>
    %21 = arith.maximumf %19, %20 : vector<24x32xf32>
    %c0_15 = arith.constant 0 : index
    %c0_16 = arith.constant 0 : index
    %22 = vector.load %arg7[%c0_15, %c0_16] : memref<24x32xf32, #tpu.memory_space<vmem>>, vector<24x32xf32>
    tpu.vector_store %arg7[%c0_15, %c0_16], %21 {strides = array<i32>} : memref<24x32xf32, #tpu.memory_space<vmem>>, vector<24x32xf32>,
    return
  }
  func.func @transform_0(%arg0: i32) -> (i32, i32) {
    %c0_i32 = arith.constant 0 : i32
    %c0_i32_0 = arith.constant 0 : i32
    return %arg0, %c0_i32 : i32, i32
  }
  func.func @transform_1(%arg0: i32) -> (i32, i32) {
    %c0_i32 = arith.constant 0 : i32
    %c0_i32_0 = arith.constant 0 : i32
    return %arg0, %c0_i32 : i32, i32
  }
  func.func @transform_2(%arg0: i32) -> (i32, i32) {
    %c0_i32 = arith.constant 0 : i32
    %c0_i32_0 = arith.constant 0 : i32
    %c0_i32_1 = arith.constant 0 : i32
    return %c0_i32, %c0_i32_0 : i32, i32
  }
  func.func @transform_3(%arg0: i32) -> (i32, i32) {
    %c0_i32 = arith.constant 0 : i32
    %c0_i32_0 = arith.constant 0 : i32
    %c0_i32_1 = arith.constant 0 : i32
    return %c0_i32, %c0_i32_0 : i32, i32
  }
  func.func @transform_4(%arg0: i32) -> (i32, i32) {
    %c0_i32 = arith.constant 0 : i32
    %c0_i32_0 = arith.constant 0 : i32
    %c0_i32_1 = arith.constant 0 : i32
    return %c0_i32, %c0_i32_0 : i32, i32
  }
  func.func @transform_5(%arg0: i32) -> (i32, i32) {
    %c0_i32 = arith.constant 0 : i32
    %c0_i32_0 = arith.constant 0 : i32
    %c0_i32_1 = arith.constant 0 : i32
    return %c0_i32, %c0_i32_0 : i32, i32
  }
  func.func @transform_6(%arg0: i32) -> (i32, i32) {
    %c0_i32 = arith.constant 0 : i32
    %c0_i32_0 = arith.constant 0 : i32
    return %arg0, %c0_i32 : i32, i32
  }
}

module attributes {stable_mosaic.version = 11 : i64} {
  func.func @_chain_kernel(%arg0: i32, %arg1: memref<16x32xbf16, #tpu.memory_space<vmem>>, %arg2: memref<32x128xbf16, #tpu.memory_space<vmem>>, %arg3: memref<1x128xf32, #tpu.memory_space<vmem>>, %arg4: memref<128x256xbf16, #tpu.memory_space<vmem>>, %arg5: memref<1x256xf32, #tpu.memory_space<vmem>>, %arg6: memref<16x256xf32, #tpu.memory_space<vmem>>) attributes {dimension_semantics = [#tpu.dimension_semantics<parallel>], iteration_bounds = array<i64: 1>, scalar_prefetch = 0 : i64, scratch_operands = 0 : i64, tpu.core_type = #tpu.core_type<tc>, window_params = [{transform_indices = @transform_0, window_bounds = array<i64: 16, 32>}, {pipeline_mode = #tpu.pipeline_mode<synchronous>, transform_indices = @transform_1, window_bounds = array<i64: 32, 128>}, {pipeline_mode = #tpu.pipeline_mode<synchronous>, transform_indices = @transform_2, window_bounds = array<i64: 1, 128>}, {pipeline_mode = #tpu.pipeline_mode<synchronous>, transform_indices = @transform_3, window_bounds = array<i64: 128, 256>}, {pipeline_mode = #tpu.pipeline_mode<synchronous>, transform_indices = @transform_4, window_bounds = array<i64: 1, 256>}, {transform_indices = @transform_5, window_bounds = array<i64: 16, 256>}]} {
    %c0 = arith.constant 0 : index
    %c0_0 = arith.constant 0 : index
    %0 = vector.load %arg1[%c0, %c0_0] : memref<16x32xbf16, #tpu.memory_space<vmem>>, vector<16x32xbf16>
    %1 = arith.extf %0 : vector<16x32xbf16> to vector<16x32xf32>
    %c0_1 = arith.constant 0 : index
    %c0_2 = arith.constant 0 : index
    %2 = vector.load %arg2[%c0_1, %c0_2] : memref<32x128xbf16, #tpu.memory_space<vmem>>, vector<32x128xbf16>
    %c0_3 = arith.constant 0 : index
    %c0_4 = arith.constant 0 : index
    %3 = vector.load %arg3[%c0_3, %c0_4] : memref<1x128xf32, #tpu.memory_space<vmem>>, vector<1x128xf32>
    %4 = arith.truncf %1 : vector<16x32xf32> to vector<16x32xbf16>
    %cst = arith.constant dense<0.000000e+00> : vector<16x128xf32>
    %5 = tpu.matmul %4, %2, %cst {dimension_numbers = #tpu.dot_dimension_numbers<[1], [0], [0], [1], [0, 0, 1, 1], [], []>} : vector<16x32xbf16>, vector<32x128xbf16>, vector<16x128xf32> -> vector<16x128xf32>
    %6 = vector.broadcast %3 : vector<1x128xf32> to vector<16x128xf32>
    %7 = arith.addf %5, %6 : vector<16x128xf32>
    %cst_5 = arith.constant 0.000000e+00 : f32
    %8 = vector.broadcast %cst_5 : f32 to vector<16x128xf32>
    %9 = arith.maximumf %7, %8 : vector<16x128xf32>
    %c0_6 = arith.constant 0 : index
    %c0_7 = arith.constant 0 : index
    %10 = vector.load %arg4[%c0_6, %c0_7] : memref<128x256xbf16, #tpu.memory_space<vmem>>, vector<128x256xbf16>
    %c0_8 = arith.constant 0 : index
    %c0_9 = arith.constant 0 : index
    %11 = vector.load %arg5[%c0_8, %c0_9] : memref<1x256xf32, #tpu.memory_space<vmem>>, vector<1x256xf32>
    %12 = arith.truncf %9 : vector<16x128xf32> to vector<16x128xbf16>
    %cst_10 = arith.constant dense<0.000000e+00> : vector<16x256xf32>
    %13 = tpu.matmul %12, %10, %cst_10 {dimension_numbers = #tpu.dot_dimension_numbers<[1], [0], [0], [1], [0, 0, 1, 1], [], []>} : vector<16x128xbf16>, vector<128x256xbf16>, vector<16x256xf32> -> vector<16x256xf32>
    %14 = vector.broadcast %11 : vector<1x256xf32> to vector<16x256xf32>
    %15 = arith.addf %13, %14 : vector<16x256xf32>
    %cst_11 = arith.constant 0.000000e+00 : f32
    %16 = vector.broadcast %cst_11 : f32 to vector<16x256xf32>
    %17 = arith.maximumf %15, %16 : vector<16x256xf32>
    %c0_12 = arith.constant 0 : index
    %c0_13 = arith.constant 0 : index
    %18 = vector.load %arg6[%c0_12, %c0_13] : memref<16x256xf32, #tpu.memory_space<vmem>>, vector<16x256xf32>
    tpu.vector_store %arg6[%c0_12, %c0_13], %17 {strides = array<i32>} : memref<16x256xf32, #tpu.memory_space<vmem>>, vector<16x256xf32>,
    return
  }
  func.func @transform_0(%arg0: i32) -> (i32, i32) {
    %c0_i32 = arith.constant 0 : i32
    %c0_i32_0 = arith.constant 0 : i32
    return %arg0, %c0_i32 : i32, i32
  }
  func.func @transform_1(%arg0: i32) -> (i32, i32) {
    %c0_i32 = arith.constant 0 : i32
    %c0_i32_0 = arith.constant 0 : i32
    %c0_i32_1 = arith.constant 0 : i32
    return %c0_i32, %c0_i32_0 : i32, i32
  }
  func.func @transform_2(%arg0: i32) -> (i32, i32) {
    %c0_i32 = arith.constant 0 : i32
    %c0_i32_0 = arith.constant 0 : i32
    %c0_i32_1 = arith.constant 0 : i32
    return %c0_i32, %c0_i32_0 : i32, i32
  }
  func.func @transform_3(%arg0: i32) -> (i32, i32) {
    %c0_i32 = arith.constant 0 : i32
    %c0_i32_0 = arith.constant 0 : i32
    %c0_i32_1 = arith.constant 0 : i32
    return %c0_i32, %c0_i32_0 : i32, i32
  }
  func.func @transform_4(%arg0: i32) -> (i32, i32) {
    %c0_i32 = arith.constant 0 : i32
    %c0_i32_0 = arith.constant 0 : i32
    %c0_i32_1 = arith.constant 0 : i32
    return %c0_i32, %c0_i32_0 : i32, i32
  }
  func.func @transform_5(%arg0: i32) -> (i32, i32) {
    %c0_i32 = arith.constant 0 : i32
    %c0_i32_0 = arith.constant 0 : i32
    return %arg0, %c0_i32 : i32, i32
  }
}

module attributes {stable_mosaic.version = 11 : i64} {
  func.func @_chain_kernel(%arg0: i32, %arg1: memref<16x256xbf16, #tpu.memory_space<vmem>>, %arg2: memref<256x256xbf16, #tpu.memory_space<vmem>>, %arg3: memref<1x256xf32, #tpu.memory_space<vmem>>, %arg4: memref<16x256xf32, #tpu.memory_space<vmem>>) attributes {dimension_semantics = [#tpu.dimension_semantics<parallel>], iteration_bounds = array<i64: 1>, scalar_prefetch = 0 : i64, scratch_operands = 0 : i64, tpu.core_type = #tpu.core_type<tc>, window_params = [{transform_indices = @transform_0, window_bounds = array<i64: 16, 256>}, {pipeline_mode = #tpu.pipeline_mode<synchronous>, transform_indices = @transform_1, window_bounds = array<i64: 256, 256>}, {pipeline_mode = #tpu.pipeline_mode<synchronous>, transform_indices = @transform_2, window_bounds = array<i64: 1, 256>}, {transform_indices = @transform_3, window_bounds = array<i64: 16, 256>}]} {
    %c0 = arith.constant 0 : index
    %c0_0 = arith.constant 0 : index
    %0 = vector.load %arg1[%c0, %c0_0] : memref<16x256xbf16, #tpu.memory_space<vmem>>, vector<16x256xbf16>
    %1 = arith.extf %0 : vector<16x256xbf16> to vector<16x256xf32>
    %c0_1 = arith.constant 0 : index
    %c0_2 = arith.constant 0 : index
    %2 = vector.load %arg2[%c0_1, %c0_2] : memref<256x256xbf16, #tpu.memory_space<vmem>>, vector<256x256xbf16>
    %c0_3 = arith.constant 0 : index
    %c0_4 = arith.constant 0 : index
    %3 = vector.load %arg3[%c0_3, %c0_4] : memref<1x256xf32, #tpu.memory_space<vmem>>, vector<1x256xf32>
    %4 = arith.truncf %1 : vector<16x256xf32> to vector<16x256xbf16>
    %cst = arith.constant dense<0.000000e+00> : vector<16x256xf32>
    %5 = tpu.matmul %4, %2, %cst {dimension_numbers = #tpu.dot_dimension_numbers<[1], [0], [0], [1], [0, 0, 1, 1], [], []>} : vector<16x256xbf16>, vector<256x256xbf16>, vector<16x256xf32> -> vector<16x256xf32>
    %6 = vector.broadcast %3 : vector<1x256xf32> to vector<16x256xf32>
    %7 = arith.addf %5, %6 : vector<16x256xf32>
    %c0_5 = arith.constant 0 : index
    %c0_6 = arith.constant 0 : index
    %8 = vector.load %arg4[%c0_5, %c0_6] : memref<16x256xf32, #tpu.memory_space<vmem>>, vector<16x256xf32>
    tpu.vector_store %arg4[%c0_5, %c0_6], %7 {strides = array<i32>} : memref<16x256xf32, #tpu.memory_space<vmem>>, vector<16x256xf32>,
    return
  }
  func.func @transform_0(%arg0: i32) -> (i32, i32) {
    %c0_i32 = arith.constant 0 : i32
    %c0_i32_0 = arith.constant 0 : i32
    return %arg0, %c0_i32 : i32, i32
  }
  func.func @transform_1(%arg0: i32) -> (i32, i32) {
    %c0_i32 = arith.constant 0 : i32
    %c0_i32_0 = arith.constant 0 : i32
    %c0_i32_1 = arith.constant 0 : i32
    return %c0_i32, %c0_i32_0 : i32, i32
  }
  func.func @transform_2(%arg0: i32) -> (i32, i32) {
    %c0_i32 = arith.constant 0 : i32
    %c0_i32_0 = arith.constant 0 : i32
    %c0_i32_1 = arith.constant 0 : i32
    return %c0_i32, %c0_i32_0 : i32, i32
  }
  func.func @transform_3(%arg0: i32) -> (i32, i32) {
    %c0_i32 = arith.constant 0 : i32
    %c0_i32_0 = arith.constant 0 : i32
    return %arg0, %c0_i32 : i32, i32
  }
}

module attributes {stable_mosaic.version = 11 : i64} {
  func.func @_gat_flash_kernel(%arg0: i32, %arg1: i32, %arg2: i32, %arg3: memref<1x128x1xf32, #tpu.memory_space<vmem>>, %arg4: memref<1x1x128xf32, #tpu.memory_space<vmem>>, %arg5: memref<1x128x128xbf16, #tpu.memory_space<vmem>>, %arg6: memref<1x128x64xbf16, #tpu.memory_space<vmem>>, %arg7: memref<1x1x64xf32, #tpu.memory_space<vmem>>, %arg8: memref<1x128x64xf32, #tpu.memory_space<vmem>>, %arg9: memref<1x128x1xf32, #tpu.memory_space<vmem>>, %arg10: memref<1x128x1xf32, #tpu.memory_space<vmem>>, %arg11: memref<1x128x64xf32, #tpu.memory_space<vmem>>) attributes {dimension_semantics = [#tpu.dimension_semantics<parallel>, #tpu.dimension_semantics<parallel>, #tpu.dimension_semantics<arbitrary>], iteration_bounds = array<i64: 4, 1, 1>, scalar_prefetch = 0 : i64, scratch_operands = 3 : i64, tpu.core_type = #tpu.core_type<tc>, window_params = [{transform_indices = @transform_0, window_bounds = array<i64: 1, 128, 1>}, {transform_indices = @transform_1, window_bounds = array<i64: 1, 1, 128>}, {transform_indices = @transform_2, window_bounds = array<i64: 1, 128, 128>}, {transform_indices = @transform_3, window_bounds = array<i64: 1, 128, 64>}, {transform_indices = @transform_4, window_bounds = array<i64: 1, 1, 64>}, {transform_indices = @transform_5, window_bounds = array<i64: 1, 128, 64>}]} {
    %c0_i32 = arith.constant 0 : i32
    %0 = arith.cmpi eq, %arg2, %c0_i32 : i32
    %1 = arith.extui %0 : i1 to i32
    %c0_i32_0 = arith.constant 0 : i32
    %2 = arith.cmpi ne, %1, %c0_i32_0 : i32
    scf.if %2 {
      %cst_38 = arith.constant -1.000000e+30 : f32
      %46 = vector.broadcast %cst_38 : f32 to vector<1x128x1xf32>
      %c0_39 = arith.constant 0 : index
      %c0_40 = arith.constant 0 : index
      %c0_41 = arith.constant 0 : index
      %47 = vector.load %arg9[%c0_39, %c0_40, %c0_41] : memref<1x128x1xf32, #tpu.memory_space<vmem>>, vector<1x128x1xf32>
      tpu.vector_store %arg9[%c0_39, %c0_40, %c0_41], %46 {strides = array<i32>} : memref<1x128x1xf32, #tpu.memory_space<vmem>>, vector<1x128x1xf32>,
      %cst_42 = arith.constant 0.000000e+00 : f32
      %48 = vector.broadcast %cst_42 : f32 to vector<1x128x1xf32>
      %c0_43 = arith.constant 0 : index
      %c0_44 = arith.constant 0 : index
      %c0_45 = arith.constant 0 : index
      %49 = vector.load %arg10[%c0_43, %c0_44, %c0_45] : memref<1x128x1xf32, #tpu.memory_space<vmem>>, vector<1x128x1xf32>
      tpu.vector_store %arg10[%c0_43, %c0_44, %c0_45], %48 {strides = array<i32>} : memref<1x128x1xf32, #tpu.memory_space<vmem>>, vector<1x128x1xf32>,
      %cst_46 = arith.constant 0.000000e+00 : f32
      %50 = vector.broadcast %cst_46 : f32 to vector<1x128x64xf32>
      %c0_47 = arith.constant 0 : index
      %c0_48 = arith.constant 0 : index
      %c0_49 = arith.constant 0 : index
      %51 = vector.load %arg11[%c0_47, %c0_48, %c0_49] : memref<1x128x64xf32, #tpu.memory_space<vmem>>, vector<1x128x64xf32>
      tpu.vector_store %arg11[%c0_47, %c0_48, %c0_49], %50 {strides = array<i32>} : memref<1x128x64xf32, #tpu.memory_space<vmem>>, vector<1x128x64xf32>,
    } else {
    }
    %c0 = arith.constant 0 : index
    %c0_1 = arith.constant 0 : index
    %c0_2 = arith.constant 0 : index
    %3 = vector.load %arg3[%c0, %c0_1, %c0_2] : memref<1x128x1xf32, #tpu.memory_space<vmem>>, vector<1x128x1xf32>
    %c0_3 = arith.constant 0 : index
    %c0_4 = arith.constant 0 : index
    %c0_5 = arith.constant 0 : index
    %4 = vector.load %arg4[%c0_3, %c0_4, %c0_5] : memref<1x1x128xf32, #tpu.memory_space<vmem>>, vector<1x1x128xf32>
    %5 = vector.broadcast %3 : vector<1x128x1xf32> to vector<1x128x128xf32>
    %6 = vector.broadcast %4 : vector<1x1x128xf32> to vector<1x128x128xf32>
    %7 = arith.addf %5, %6 : vector<1x128x128xf32>
    %cst = arith.constant 0.000000e+00 : f32
    %8 = vector.broadcast %cst : f32 to vector<1x128x128xf32>
    %9 = arith.cmpf oge, %7, %8 : vector<1x128x128xf32>
    %cst_6 = arith.constant 2.000000e-01 : f32
    %10 = vector.broadcast %cst_6 : f32 to vector<1x128x128xf32>
    %11 = arith.mulf %10, %7 : vector<1x128x128xf32>
    %12 = arith.select %9, %7, %11 : vector<1x128x128xi1>, vector<1x128x128xf32>
    %c0_7 = arith.constant 0 : index
    %c0_8 = arith.constant 0 : index
    %c0_9 = arith.constant 0 : index
    %13 = vector.load %arg5[%c0_7, %c0_8, %c0_9] : memref<1x128x128xbf16, #tpu.memory_space<vmem>>, vector<1x128x128xbf16>
    %14 = arith.extf %13 : vector<1x128x128xbf16> to vector<1x128x128xf32>
    %cst_10 = arith.constant 0.000000e+00 : f32
    %15 = vector.broadcast %cst_10 : f32 to vector<1x128x128xf32>
    %16 = arith.cmpf ogt, %14, %15 : vector<1x128x128xf32>
    %cst_11 = arith.constant -1.000000e+30 : f32
    %17 = vector.broadcast %cst_11 : f32 to vector<1x128x128xf32>
    %18 = arith.select %16, %12, %17 : vector<1x128x128xi1>, vector<1x128x128xf32>
    %c0_12 = arith.constant 0 : index
    %c0_13 = arith.constant 0 : index
    %c0_14 = arith.constant 0 : index
    %19 = vector.load %arg9[%c0_12, %c0_13, %c0_14] : memref<1x128x1xf32, #tpu.memory_space<vmem>>, vector<1x128x1xf32>
    %cst_15 = arith.constant dense<0xFF800000> : vector<1x128xf32>
    %20 = vector.multi_reduction <maximumf>, %18, %cst_15 [2] : vector<1x128x128xf32> to vector<1x128xf32>
    %21 = vector.shape_cast %20 : vector<1x128xf32> to vector<1x128x1xf32>
    %22 = arith.maximumf %19, %21 : vector<1x128x1xf32>
    %23 = arith.subf %19, %22 : vector<1x128x1xf32>
    %24 = math.exp %23 : vector<1x128x1xf32>
    %25 = vector.broadcast %22 : vector<1x128x1xf32> to vector<1x128x128xf32>
    %26 = arith.subf %18, %25 : vector<1x128x128xf32>
    %27 = math.exp %26 : vector<1x128x128xf32>
    %c0_16 = arith.constant 0 : index
    %c0_17 = arith.constant 0 : index
    %c0_18 = arith.constant 0 : index
    %28 = vector.load %arg10[%c0_16, %c0_17, %c0_18] : memref<1x128x1xf32, #tpu.memory_space<vmem>>, vector<1x128x1xf32>
    %29 = arith.mulf %24, %28 : vector<1x128x1xf32>
    %cst_19 = arith.constant dense<0.000000e+00> : vector<1x128xf32>
    %30 = vector.multi_reduction <add>, %27, %cst_19 [2] : vector<1x128x128xf32> to vector<1x128xf32>
    %31 = vector.shape_cast %30 : vector<1x128xf32> to vector<1x128x1xf32>
    %32 = arith.addf %29, %31 : vector<1x128x1xf32>
    %c0_20 = arith.constant 0 : index
    %c0_21 = arith.constant 0 : index
    %c0_22 = arith.constant 0 : index
    %33 = vector.load %arg10[%c0_20, %c0_21, %c0_22] : memref<1x128x1xf32, #tpu.memory_space<vmem>>, vector<1x128x1xf32>
    tpu.vector_store %arg10[%c0_20, %c0_21, %c0_22], %32 {strides = array<i32>} : memref<1x128x1xf32, #tpu.memory_space<vmem>>, vector<1x128x1xf32>,
    %c0_23 = arith.constant 0 : index
    %c0_24 = arith.constant 0 : index
    %c0_25 = arith.constant 0 : index
    %34 = vector.load %arg11[%c0_23, %c0_24, %c0_25] : memref<1x128x64xf32, #tpu.memory_space<vmem>>, vector<1x128x64xf32>
    %35 = vector.broadcast %24 : vector<1x128x1xf32> to vector<1x128x64xf32>
    %36 = arith.mulf %35, %34 : vector<1x128x64xf32>
    %37 = arith.truncf %27 : vector<1x128x128xf32> to vector<1x128x128xbf16>
    %c0_26 = arith.constant 0 : index
    %c0_27 = arith.constant 0 : index
    %c0_28 = arith.constant 0 : index
    %38 = vector.load %arg6[%c0_26, %c0_27, %c0_28] : memref<1x128x64xbf16, #tpu.memory_space<vmem>>, vector<1x128x64xbf16>
    "tpu.trace_start"() <{level = 10 : i32, message = "bqk,bkc->bqc"}> : () -> ()
    %cst_29 = arith.constant dense<0.000000e+00> : vector<1x128x64xf32>
    %39 = tpu.matmul %37, %38, %cst_29 {dimension_numbers = #tpu.dot_dimension_numbers<[2], [1], [1], [2], [0, 0, 0, 1, 1, 2], [0], [0]>} : vector<1x128x128xbf16>, vector<1x128x64xbf16>, vector<1x128x64xf32> -> vector<1x128x64xf32>
    "tpu.trace_stop"() : () -> ()
    %40 = arith.addf %36, %39 : vector<1x128x64xf32>
    %c0_30 = arith.constant 0 : index
    %c0_31 = arith.constant 0 : index
    %c0_32 = arith.constant 0 : index
    %41 = vector.load %arg11[%c0_30, %c0_31, %c0_32] : memref<1x128x64xf32, #tpu.memory_space<vmem>>, vector<1x128x64xf32>
    tpu.vector_store %arg11[%c0_30, %c0_31, %c0_32], %40 {strides = array<i32>} : memref<1x128x64xf32, #tpu.memory_space<vmem>>, vector<1x128x64xf32>,
    %c0_33 = arith.constant 0 : index
    %c0_34 = arith.constant 0 : index
    %c0_35 = arith.constant 0 : index
    %42 = vector.load %arg9[%c0_33, %c0_34, %c0_35] : memref<1x128x1xf32, #tpu.memory_space<vmem>>, vector<1x128x1xf32>
    tpu.vector_store %arg9[%c0_33, %c0_34, %c0_35], %22 {strides = array<i32>} : memref<1x128x1xf32, #tpu.memory_space<vmem>>, vector<1x128x1xf32>,
    %c0_i32_36 = arith.constant 0 : i32
    %43 = arith.cmpi eq, %arg2, %c0_i32_36 : i32
    %44 = arith.extui %43 : i1 to i32
    %c0_i32_37 = arith.constant 0 : i32
    %45 = arith.cmpi ne, %44, %c0_i32_37 : i32
    scf.if %45 {
      %c0_38 = arith.constant 0 : index
      %c0_39 = arith.constant 0 : index
      %c0_40 = arith.constant 0 : index
      %46 = vector.load %arg10[%c0_38, %c0_39, %c0_40] : memref<1x128x1xf32, #tpu.memory_space<vmem>>, vector<1x128x1xf32>
      %cst_41 = arith.constant 9.99999996E-13 : f32
      %47 = vector.broadcast %cst_41 : f32 to vector<1x128x1xf32>
      %48 = arith.maximumf %46, %47 : vector<1x128x1xf32>
      %49 = tpu.reciprocal %48 {approx = true} : vector<1x128x1xf32> -> vector<1x128x1xf32>
      %c0_42 = arith.constant 0 : index
      %c0_43 = arith.constant 0 : index
      %c0_44 = arith.constant 0 : index
      %50 = vector.load %arg11[%c0_42, %c0_43, %c0_44] : memref<1x128x64xf32, #tpu.memory_space<vmem>>, vector<1x128x64xf32>
      %51 = vector.broadcast %49 : vector<1x128x1xf32> to vector<1x128x64xf32>
      %52 = arith.mulf %50, %51 : vector<1x128x64xf32>
      %c0_45 = arith.constant 0 : index
      %c0_46 = arith.constant 0 : index
      %c0_47 = arith.constant 0 : index
      %53 = vector.load %arg7[%c0_45, %c0_46, %c0_47] : memref<1x1x64xf32, #tpu.memory_space<vmem>>, vector<1x1x64xf32>
      %54 = vector.broadcast %53 : vector<1x1x64xf32> to vector<1x128x64xf32>
      %55 = arith.addf %52, %54 : vector<1x128x64xf32>
      %cst_48 = arith.constant 0.000000e+00 : f32
      %56 = vector.broadcast %cst_48 : f32 to vector<1x128x64xf32>
      %57 = arith.maximumf %55, %56 : vector<1x128x64xf32>
      %c0_49 = arith.constant 0 : index
      %c0_50 = arith.constant 0 : index
      %c0_51 = arith.constant 0 : index
      %58 = vector.load %arg8[%c0_49, %c0_50, %c0_51] : memref<1x128x64xf32, #tpu.memory_space<vmem>>, vector<1x128x64xf32>
      tpu.vector_store %arg8[%c0_49, %c0_50, %c0_51], %57 {strides = array<i32>} : memref<1x128x64xf32, #tpu.memory_space<vmem>>, vector<1x128x64xf32>,
    } else {
    }
    return
  }
  func.func @transform_0(%arg0: i32, %arg1: i32, %arg2: i32) -> (i32, i32, i32) {
    %c0_i32 = arith.constant 0 : i32
    %c0_i32_0 = arith.constant 0 : i32
    return %arg0, %arg1, %c0_i32 : i32, i32, i32
  }
  func.func @transform_1(%arg0: i32, %arg1: i32, %arg2: i32) -> (i32, i32, i32) {
    %c0_i32 = arith.constant 0 : i32
    %c0_i32_0 = arith.constant 0 : i32
    return %arg0, %c0_i32, %arg2 : i32, i32, i32
  }
  func.func @transform_2(%arg0: i32, %arg1: i32, %arg2: i32) -> (i32, i32, i32) {
    %c0_i32 = arith.constant 0 : i32
    %c0_i32_0 = arith.constant 0 : i32
    return %c0_i32, %arg1, %arg2 : i32, i32, i32
  }
  func.func @transform_3(%arg0: i32, %arg1: i32, %arg2: i32) -> (i32, i32, i32) {
    %c0_i32 = arith.constant 0 : i32
    %c0_i32_0 = arith.constant 0 : i32
    return %arg0, %arg2, %c0_i32 : i32, i32, i32
  }
  func.func @transform_4(%arg0: i32, %arg1: i32, %arg2: i32) -> (i32, i32, i32) {
    %c0_i32 = arith.constant 0 : i32
    %c0_i32_0 = arith.constant 0 : i32
    %c0_i32_1 = arith.constant 0 : i32
    return %arg0, %c0_i32, %c0_i32_0 : i32, i32, i32
  }
  func.func @transform_5(%arg0: i32, %arg1: i32, %arg2: i32) -> (i32, i32, i32) {
    %c0_i32 = arith.constant 0 : i32
    %c0_i32_0 = arith.constant 0 : i32
    return %arg0, %arg1, %c0_i32 : i32, i32, i32
  }
}

module attributes {stable_mosaic.version = 11 : i64} {
  func.func @_chain_kernel(%arg0: i32, %arg1: memref<8x512xbf16, #tpu.memory_space<vmem>>, %arg2: memref<512x128xbf16, #tpu.memory_space<vmem>>, %arg3: memref<1x128xf32, #tpu.memory_space<vmem>>, %arg4: memref<128x64xbf16, #tpu.memory_space<vmem>>, %arg5: memref<1x64xf32, #tpu.memory_space<vmem>>, %arg6: memref<64x2xbf16, #tpu.memory_space<vmem>>, %arg7: memref<1x2xf32, #tpu.memory_space<vmem>>, %arg8: memref<8x2xf32, #tpu.memory_space<vmem>>) attributes {dimension_semantics = [#tpu.dimension_semantics<parallel>], iteration_bounds = array<i64: 1>, scalar_prefetch = 0 : i64, scratch_operands = 0 : i64, tpu.core_type = #tpu.core_type<tc>, window_params = [{transform_indices = @transform_0, window_bounds = array<i64: 8, 512>}, {pipeline_mode = #tpu.pipeline_mode<synchronous>, transform_indices = @transform_1, window_bounds = array<i64: 512, 128>}, {pipeline_mode = #tpu.pipeline_mode<synchronous>, transform_indices = @transform_2, window_bounds = array<i64: 1, 128>}, {pipeline_mode = #tpu.pipeline_mode<synchronous>, transform_indices = @transform_3, window_bounds = array<i64: 128, 64>}, {pipeline_mode = #tpu.pipeline_mode<synchronous>, transform_indices = @transform_4, window_bounds = array<i64: 1, 64>}, {pipeline_mode = #tpu.pipeline_mode<synchronous>, transform_indices = @transform_5, window_bounds = array<i64: 64, 2>}, {pipeline_mode = #tpu.pipeline_mode<synchronous>, transform_indices = @transform_6, window_bounds = array<i64: 1, 2>}, {transform_indices = @transform_7, window_bounds = array<i64: 8, 2>}]} {
    %c0 = arith.constant 0 : index
    %c0_0 = arith.constant 0 : index
    %0 = vector.load %arg1[%c0, %c0_0] : memref<8x512xbf16, #tpu.memory_space<vmem>>, vector<8x512xbf16>
    %1 = arith.extf %0 : vector<8x512xbf16> to vector<8x512xf32>
    %c0_1 = arith.constant 0 : index
    %c0_2 = arith.constant 0 : index
    %2 = vector.load %arg2[%c0_1, %c0_2] : memref<512x128xbf16, #tpu.memory_space<vmem>>, vector<512x128xbf16>
    %c0_3 = arith.constant 0 : index
    %c0_4 = arith.constant 0 : index
    %3 = vector.load %arg3[%c0_3, %c0_4] : memref<1x128xf32, #tpu.memory_space<vmem>>, vector<1x128xf32>
    %4 = arith.truncf %1 : vector<8x512xf32> to vector<8x512xbf16>
    %cst = arith.constant dense<0.000000e+00> : vector<8x128xf32>
    %5 = tpu.matmul %4, %2, %cst {dimension_numbers = #tpu.dot_dimension_numbers<[1], [0], [0], [1], [0, 0, 1, 1], [], []>} : vector<8x512xbf16>, vector<512x128xbf16>, vector<8x128xf32> -> vector<8x128xf32>
    %6 = vector.broadcast %3 : vector<1x128xf32> to vector<8x128xf32>
    %7 = arith.addf %5, %6 : vector<8x128xf32>
    %cst_5 = arith.constant 0.000000e+00 : f32
    %8 = vector.broadcast %cst_5 : f32 to vector<8x128xf32>
    %9 = arith.maximumf %7, %8 : vector<8x128xf32>
    %c0_6 = arith.constant 0 : index
    %c0_7 = arith.constant 0 : index
    %10 = vector.load %arg4[%c0_6, %c0_7] : memref<128x64xbf16, #tpu.memory_space<vmem>>, vector<128x64xbf16>
    %c0_8 = arith.constant 0 : index
    %c0_9 = arith.constant 0 : index
    %11 = vector.load %arg5[%c0_8, %c0_9] : memref<1x64xf32, #tpu.memory_space<vmem>>, vector<1x64xf32>
    %12 = arith.truncf %9 : vector<8x128xf32> to vector<8x128xbf16>
    %cst_10 = arith.constant dense<0.000000e+00> : vector<8x64xf32>
    %13 = tpu.matmul %12, %10, %cst_10 {dimension_numbers = #tpu.dot_dimension_numbers<[1], [0], [0], [1], [0, 0, 1, 1], [], []>} : vector<8x128xbf16>, vector<128x64xbf16>, vector<8x64xf32> -> vector<8x64xf32>
    %14 = vector.broadcast %11 : vector<1x64xf32> to vector<8x64xf32>
    %15 = arith.addf %13, %14 : vector<8x64xf32>
    %cst_11 = arith.constant 0.000000e+00 : f32
    %16 = vector.broadcast %cst_11 : f32 to vector<8x64xf32>
    %17 = arith.maximumf %15, %16 : vector<8x64xf32>
    %c0_12 = arith.constant 0 : index
    %c0_13 = arith.constant 0 : index
    %18 = vector.load %arg6[%c0_12, %c0_13] : memref<64x2xbf16, #tpu.memory_space<vmem>>, vector<64x2xbf16>
    %c0_14 = arith.constant 0 : index
    %c0_15 = arith.constant 0 : index
    %19 = vector.load %arg7[%c0_14, %c0_15] : memref<1x2xf32, #tpu.memory_space<vmem>>, vector<1x2xf32>
    %20 = arith.truncf %17 : vector<8x64xf32> to vector<8x64xbf16>
    %cst_16 = arith.constant dense<0.000000e+00> : vector<8x2xf32>
    %21 = tpu.matmul %20, %18, %cst_16 {dimension_numbers = #tpu.dot_dimension_numbers<[1], [0], [0], [1], [0, 0, 1, 1], [], []>} : vector<8x64xbf16>, vector<64x2xbf16>, vector<8x2xf32> -> vector<8x2xf32>
    %22 = vector.broadcast %19 : vector<1x2xf32> to vector<8x2xf32>
    %23 = arith.addf %21, %22 : vector<8x2xf32>
    %cst_17 = arith.constant dense<0xFF800000> : vector<8xf32>
    %24 = vector.multi_reduction <maximumf>, %23, %cst_17 [1] : vector<8x2xf32> to vector<8xf32>
    %25 = vector.shape_cast %24 : vector<8xf32> to vector<8x1xf32>
    %26 = vector.broadcast %25 : vector<8x1xf32> to vector<8x2xf32>
    %27 = arith.subf %23, %26 : vector<8x2xf32>
    %28 = math.exp %27 : vector<8x2xf32>
    %cst_18 = arith.constant dense<0.000000e+00> : vector<8xf32>
    %29 = vector.multi_reduction <add>, %28, %cst_18 [1] : vector<8x2xf32> to vector<8xf32>
    %30 = vector.shape_cast %29 : vector<8xf32> to vector<8x1xf32>
    %31 = math.log %30 : vector<8x1xf32>
    %32 = vector.broadcast %31 : vector<8x1xf32> to vector<8x2xf32>
    %33 = arith.subf %27, %32 : vector<8x2xf32>
    %c0_19 = arith.constant 0 : index
    %c0_20 = arith.constant 0 : index
    %34 = vector.load %arg8[%c0_19, %c0_20] : memref<8x2xf32, #tpu.memory_space<vmem>>, vector<8x2xf32>
    tpu.vector_store %arg8[%c0_19, %c0_20], %33 {strides = array<i32>} : memref<8x2xf32, #tpu.memory_space<vmem>>, vector<8x2xf32>,
    return
  }
  func.func @transform_0(%arg0: i32) -> (i32, i32) {
    %c0_i32 = arith.constant 0 : i32
    %c0_i32_0 = arith.constant 0 : i32
    return %arg0, %c0_i32 : i32, i32
  }
  func.func @transform_1(%arg0: i32) -> (i32, i32) {
    %c0_i32 = arith.constant 0 : i32
    %c0_i32_0 = arith.constant 0 : i32
    %c0_i32_1 = arith.constant 0 : i32
    return %c0_i32, %c0_i32_0 : i32, i32
  }
  func.func @transform_2(%arg0: i32) -> (i32, i32) {
    %c0_i32 = arith.constant 0 : i32
    %c0_i32_0 = arith.constant 0 : i32
    %c0_i32_1 = arith.constant 0 : i32
    return %c0_i32, %c0_i32_0 : i32, i32
  }
  func.func @transform_3(%arg0: i32) -> (i32, i32) {
    %c0_i32 = arith.constant 0 : i32
    %c0_i32_0 = arith.constant 0 : i32
    %c0_i32_1 = arith.constant 0 : i32
    return %c0_i32, %c0_i32_0 : i32, i32
  }
  func.func @transform_4(%arg0: i32) -> (i32, i32) {
    %c0_i32 = arith.constant 0 : i32
    %c0_i32_0 = arith.constant 0 : i32
    %c0_i32_1 = arith.constant 0 : i32
    return %c0_i32, %c0_i32_0 : i32, i32
  }
  func.func @transform_5(%arg0: i32) -> (i32, i32) {
    %c0_i32 = arith.constant 0 : i32
    %c0_i32_0 = arith.constant 0 : i32
    %c0_i32_1 = arith.constant 0 : i32
    return %c0_i32, %c0_i32_0 : i32, i32
  }
  func.func @transform_6(%arg0: i32) -> (i32, i32) {
    %c0_i32 = arith.constant 0 : i32
    %c0_i32_0 = arith.constant 0 : i32
    %c0_i32_1 = arith.constant 0 : i32
    return %c0_i32, %c0_i32_0 : i32, i32
  }
  func.func @transform_7(%arg0: i32) -> (i32, i32) {
    %c0_i32 = arith.constant 0 : i32
    %c0_i32_0 = arith.constant 0 : i32
    return %arg0, %c0_i32 : i32, i32
  }
}

</mosaic_0001>

<bundles_post_ra>
// kernel: net_forward.6
= control target key start
LH: loop header
LB: loop body
LE: loop exit
PB: predicated region body
PF: predicated region fallthrough
CT: control target
= control target key end

     0   :  { %v324_v0 = vmov 0.0   ;;  %vm325_vm0 = vmmov 0   ;;  %vm51_vm1 = vcmask 261120   ;;  %v326_v20 = vmov 0   ;;  %s432_s1 = inlined_call_operand.vmem [shape: bf16[32,128], index: 1, kind: input, shape index: {}]   ;;  %s433_s3 = inlined_call_operand.vmem [shape: bf16[128,256], index: 3, kind: input, shape index: {}]   ;;  %s434_s0 = inlined_call_operand.vmem [shape: bf16[16,32], index: 0, kind: input, shape index: {}]   ;;  %s435_s2 = inlined_call_operand.vmem [shape: f32[1,128], index: 2, kind: input, shape index: {}]   ;;  %s436_s4 = inlined_call_operand.vmem [shape: f32[1,256], index: 4, kind: input, shape index: {}]   ;;  %s437_s5 = inlined_call_operand.vmem [shape: f32[16,256], index: 5, kind: output, shape index: {}]  }
   0x1   :  { %286 = vmatprep.subr.bf16.mxu0 %v324_v0  ;;  %v297_v1 = vld [vmem:[%s432_s1] sm:$0xff]   ;;  %290 = vmatprep.mubr.msk.bf16.mxu0 %vm325_vm0, %v324_v0  ;;  %v298_v2 = vld [vmem:[%s432_s1 + $0x8] sm:$0xff]   ;;  %v303_v6 = vld [vmem:[%s433_s3 + $0x14] ss:$8 sps:$4 sm:$0xff]   ;;  %v117_v31 = vlaneseq }
   0x2   :  { %287 = vmatpush3.bf16.msra.mxu0 %v297_v1  ;;  %v300_v3 = vld [vmem:[%s433_s3 + $0x4] ss:$8 sps:$4 sm:$0xff]   ;;  %v302_v4 = vld [vmem:[%s433_s3] ss:$8 sps:$4 sm:$0xff]   ;;  %v305_v7 = vld [vmem:[%s433_s3 + $0x10] ss:$8 sps:$4 sm:$0xff]   ;;  %239 = vmatprep.mubr.bf16.mxu1 %v326_v20 }
   0x3   :  { %288 = vmatprep.subr.bf16.mxu0 %v324_v0  ;;  %v299_v5 = vld [vmem:[%s434_s0] sm:$0xff]   ;;  %207 = vmatprep.subr.bf16.mxu1 %v300_v3  ;;  %v309_v10 = vld [vmem:[%s433_s3 + $0x34] ss:$8 sps:$4 sm:$0xff]   ;;  %v311_v11 = vld [vmem:[%s433_s3 + $0x30] ss:$8 sps:$4 sm:$0xff]   ;;  %v118_v32 = vshrl.u32 %v117_v31, 7 }
   0x4   :  { %208 = vmatpush1.bf16.msra.mxu1 %v302_v4  ;;  %v306_v8 = vld [vmem:[%s433_s3 + $0x24] ss:$8 sps:$4 sm:$0xff]   ;;  %v308_v9 = vld [vmem:[%s433_s3 + $0x20] ss:$8 sps:$4 sm:$0xff]   ;;  %v315_v14 = vld [vmem:[%s433_s3 + $0x54] ss:$8 sps:$4 sm:$0xff]  }
   0x5   :  { %209 = vmatprep.subr.bf16.mxu1 %v303_v6  ;;  %v312_v12 = vld [vmem:[%s433_s3 + $0x44] ss:$8 sps:$4 sm:$0xff]   ;;  %v314_v13 = vld [vmem:[%s433_s3 + $0x40] ss:$8 sps:$4 sm:$0xff]   ;;  %v317_v15 = vld [vmem:[%s433_s3 + $0x50] ss:$8 sps:$4 sm:$0xff]  }
   0x6   :  { %289 = vmatpush3.bf16.msra.mxu0 %v298_v2  ;;  %v318_v16 = vld [vmem:[%s433_s3 + $0x64] ss:$8 sps:$4 sm:$0xff]   ;;  %v320_v17 = vld [vmem:[%s433_s3 + $0x60] ss:$8 sps:$4 sm:$0xff]   ;;  %v321_v18 = vld [vmem:[%s433_s3 + $0x74] ss:$8 sps:$4 sm:$0xff]  }
   0x7   :  { %v323_v19 = vld [vmem:[%s433_s3 + $0x70] ss:$8 sps:$4 sm:$0xff]   ;;  %v262_v21 = vld [vmem:[%s435_s2] ss:$0 sm:$0xff]  ;;  %v119_v33 = vsub.s32 0, %v118_v32  ;;  %v123_v35 = vsub.s32 1, %v118_v32 }
   0x8   :  { %210 = vmatpush1.bf16.msra.mxu1 %v305_v7  ;;  %v114_v34 = vld [vmem:[%s436_s4] sm:$0x3] }
   0x9   :  { %291 = vmatmul.mubr.msk.bf16.vlgmr.msra.gmra.mrb[0].mxu0 %vm51_vm1, %v299_v5  ;;  %211 = vmatprep.subr.bf16.mxu1 %v306_v8  ;;  %v120_v36 = vrot.slane %v114_v34, %v119_v33  ;;  %v124_v37 = vrot.slane %v114_v34, %v123_v35 }
   0xc   :  { %212 = vmatpush1.bf16.msra.mxu1 %v308_v9 }
   0xd   :  { %213 = vmatprep.subr.bf16.mxu1 %v309_v10 }
  0x10   :  { %214 = vmatpush1.bf16.msra.mxu1 %v311_v11 }
  0x11   :  { %215 = vmatprep.subr.bf16.mxu1 %v312_v12 }
  0x14   :  { %216 = vmatpush1.bf16.msra.mxu1 %v314_v13 }
  0x15   :  { %217 = vmatprep.subr.bf16.mxu1 %v315_v14 }
  0x18   :  { %218 = vmatpush1.bf16.msra.mxu1 %v317_v15 }
  0x19   :  { %219 = vmatprep.subr.bf16.mxu1 %v318_v16 }
  0x1c   :  { %220 = vmatpush1.bf16.msra.mxu1 %v320_v17 }
  0x1d   :  { %221 = vmatprep.subr.bf16.mxu1 %v321_v18 }
  0x20   :  { %222 = vmatpush1.bf16.msra.mxu1 %v323_v19 }
  0xdc   :  { %v89_v22 = vpop.f32.mrb[0].mxu0 }
  0xdd   :  { %v90_v23 = vadd.f32 %v262_v21, %v89_v22  ;;  %v292_v24 = vpop.f32.mrb[1].mxu0 }
  0xde   :  { %v92_v25 = vpop.f32.mrb[2].mxu0 }
  0xdf   :  { %v93_v26 = vadd.f32 %v262_v21, %v92_v25  ;;  %v293_v27 = vpop.f32.mrb[3].mxu0  ;;  %v96_v28 = vmax.f32 %v90_v23, 0.0 }
  0xe1   :  { %v97_v29 = vmax.f32 %v93_v26, 0.0 }
  0xe3   :  { %v115_v30 = vpack.c.bf16 %v97_v29, %v96_v28 }
  0xe5   :  { %240 = vmatmul.mubr.bf16.vlgmr.msra.gmra.mrb[0].mxu1 %v115_v30 }
 0x1b8   :  { %v241_v38 = vpop.f32.mrb[0].mxu1 }
 0x1b9   :  { %v242_v39 = vadd.f32 %v241_v38, %v120_v36  ;;  %v243_v40 = vpop.f32.mrb[1].mxu1 }
 0x1ba   :  { %v244_v41 = vadd.f32 %v243_v40, %v124_v37  ;;  %v245_v42 = vpop.f32.mrb[2].mxu1 }
 0x1bb   :  { %v250_v43 = vmax.f32 %v242_v39, 0.0  ;;  %v246_v44 = vadd.f32 %v245_v42, %v120_v36  ;;  %v247_v45 = vpop.f32.mrb[3].mxu1 }
 0x1bc   :  { %v251_v46 = vmax.f32 %v244_v41, 0.0  ;;  %v248_v47 = vadd.f32 %v247_v45, %v124_v37 }
 0x1bd   :  { %254 = vst [vmem:[%s437_s5] sm:$0xff] %v250_v43  ;;  %v252_v48 = vmax.f32 %v246_v44, 0.0 }
 0x1be   :  { %255 = vst [vmem:[%s437_s5 + $0x8] sm:$0xff] %v251_v46  ;;  %v253_v49 = vmax.f32 %v248_v47, 0.0 }
 0x1bf   :  { %256 = vst [vmem:[%s437_s5 + $0x10] sm:$0xff] %v252_v48 }
 0x1c0   :  { %257 = vst [vmem:[%s437_s5 + $0x18] sm:$0xff] %v253_v49 }

// kernel: net_forward.5
= control target key start
LH: loop header
LB: loop body
LE: loop exit
PB: predicated region body
PF: predicated region fallthrough
CT: control target
= control target key end

     0   :  { %vm94_vm0 = vcmask 818176   ;;  %vm101_vm1 = vcmask 1041408   ;;  %vm197_vm2 = vcmask 523264   ;;  %vm264_vm3 = vcmask 261120   ;;  %s450_s2 = inlined_call_operand.vmem [shape: bf16[100,64], index: 2, kind: input, shape index: {}]   ;;  %s451_s0 = inlined_call_operand.vmem [shape: bf16[24,100], index: 0, kind: input, shape index: {}]   ;;  %s452_s4 = inlined_call_operand.vmem [shape: bf16[64,32], index: 4, kind: input, shape index: {}]   ;;  %s453_s3 = inlined_call_operand.vmem [shape: f32[1,64], index: 3, kind: input, shape index: {}]   ;;  %s454_s5 = inlined_call_operand.vmem [shape: f32[1,32], index: 5, kind: input, shape index: {}]   ;;  %s455_s1 = inlined_call_operand.vmem [shape: f32[24,32], index: 1, kind: input, shape index: {}]   ;;  %s456_s6 = inlined_call_operand.vmem [shape: f32[24,32], index: 6, kind: output, shape index: {}]  }
   0x1   :  { %v337_v0 = vld [vmem:[%s450_s2] sm:$0xff]   ;;  %v338_v1 = vld [vmem:[%s450_s2 + $0x8] sm:$0xff]   ;;  %v339_v2 = vld [vmem:[%s450_s2 + $0x10] sm:$0xff]  }
   0x2   :  { %306 = vmatprep.subr.bf16.mxu0 %v337_v0  ;;  %v344_v3 = vld [vmem:[%s451_s0] sm:$0xff]   ;;  %v340_v4 = vld [vmem:[%s450_s2 + $0x18] sm:$0xff]   ;;  %v347_v6 = vld [vmem:[%s452_s4 + $0x8] sm:$0xff]  }
   0x3   :  { %307 = vmatpush3.bf16.msra.mxu0 %v337_v0  ;;  %320 = vmatprep.mubr.msk.bf16.mxu0 %vm94_vm0, %v344_v3  ;;  %v346_v5 = vld [vmem:[%s452_s4] sm:$0xff]   ;;  %v342_v8 = vld [vmem:[%s450_s2 + $0x28] sm:$0xff]   ;;  %v343_v9 = vld [vmem:[%s450_s2 + $0x30] ss:$0 sps:$4 sm:$0x33]  }
   0x4   :  { %308 = vmatprep.subr.bf16.mxu0 %v338_v1  ;;  %324 = vmatprep.subr.bf16.mxu1 %v346_v5  ;;  %v341_v7 = vld [vmem:[%s450_s2 + $0x20] sm:$0xff]   ;;  %v103_v10 = vsel %vm101_vm1, %v343_v9, 0  ;;  %v345_v11 = vld [vmem:[%s451_s0 + $0x8] ss:$0 sps:$4 sm:$0xff]   ;;  %v348_v12 = vld [vmem:[%s452_s4 + $0x10] sm:$0xff]  }
   0x5   :  { %325 = vmatpush3.bf16.msra.mxu1 %v346_v5  ;;  %v349_v13 = vld [vmem:[%s452_s4 + $0x18] sm:$0xff]   ;;  %v272_v14 = vld [vmem:[%s453_s3] ss:$0 sm:$0xff]  ;;  %v257_v31 = vld [vmem:[%s455_s1 + $0x10] sm:$0xff] }
   0x6   :  { %326 = vmatprep.subr.bf16.mxu1 %v347_v6  ;;  %v284_v27 = vld [vmem:[%s454_s5] ss:$0 sm:$0xff]  ;;  %v256_v40 = vld [vmem:[%s455_s1 + $0x8] sm:$0xff] }
   0x7   :  { %309 = vmatpush3.bf16.msra.mxu0 %v338_v1  ;;  %v255_v35 = vld [vmem:[%s455_s1] sm:$0xff] }
   0x8   :  { %310 = vmatprep.subr.bf16.mxu0 %v339_v2 }
   0x9   :  { %327 = vmatpush3.bf16.msra.mxu1 %v347_v6 }
   0xa   :  { %328 = vmatprep.subr.bf16.mxu1 %v348_v12 }
   0xb   :  { %311 = vmatpush3.bf16.msra.mxu0 %v339_v2 }
   0xc   :  { %312 = vmatprep.subr.bf16.mxu0 %v340_v4 }
   0xd   :  { %329 = vmatpush3.bf16.msra.mxu1 %v348_v12 }
   0xe   :  { %330 = vmatprep.subr.bf16.mxu1 %v349_v13 }
   0xf   :  { %313 = vmatpush3.bf16.msra.mxu0 %v340_v4 }
  0x10   :  { %314 = vmatprep.subr.bf16.mxu0 %v341_v7 }
  0x11   :  { %331 = vmatpush3.bf16.msra.mxu1 %v349_v13 }
  0x13   :  { %315 = vmatpush3.bf16.msra.mxu0 %v341_v7 }
  0x14   :  { %316 = vmatprep.subr.bf16.mxu0 %v342_v8 }
  0x17   :  { %317 = vmatpush3.bf16.msra.mxu0 %v342_v8 }
  0x18   :  { %336 = vmatprep.subr.msk.bf16.mxu0 %vm101_vm1, %v343_v9 }
  0x1b   :  { %319 = vmatpush3.bf16.msra.mxu0 %v103_v10 }
  0x1e   :  { %321 = vmatmul.mubr.msk.bf16.vlgmr.msra.gmra.mrb[0].mxu0 %vm94_vm0, %v345_v11 }
  0xf1   :  { %v322_v15 = vpop.f32.mrb[0].mxu0 }
  0xf2   :  { %v148_v16 = vadd.f32 %v322_v15, %v272_v14  ;;  %v139_v17 = vpop.f32.mrb[1].mxu0 }
  0xf3   :  { %v140_v18 = vadd.f32 %v272_v14, %v139_v17  ;;  %v323_v19 = vpop.f32.mrb[2].mxu0 }
  0xf4   :  { %v142_v20 = vpop.f32.mrb[3].mxu0  ;;  %v155_v22 = vmax.f32 %v148_v16, 0.0 }
  0xf5   :  { %v143_v21 = vadd.f32 %v272_v14, %v142_v20  ;;  %v153_v23 = vmax.f32 %v140_v18, 0.0 }
  0xf6   :  { %v166_v26 = vpack.c.bf16 %v155_v22, %v155_v22 }
  0xf7   :  { %v154_v24 = vmax.f32 %v143_v21, 0.0 }
  0xf9   :  { %v165_v25 = vpack.c.bf16 %v154_v24, %v153_v23 }
  0xfb   :  { %332 = vmatprep.mubr.msk.bf16.mxu1 %vm197_vm2, %v165_v25 }
  0xfc   :  { %333 = vmatmul.mubr.msk.bf16.vlgmr.msra.gmra.mrb[0].mxu1 %vm197_vm2, %v166_v26 }
 0x1cf   :  { %v334_v28 = vpop.f32.mrb[0].mxu1 }
 0x1d0   :  { %v247_v29 = vadd.f32 %v334_v28, %v284_v27  ;;  %v238_v30 = vpop.f32.mrb[1].mxu1 }
 0x1d1   :  { %v239_v32 = vadd.f32 %v284_v27, %v238_v30  ;;  %v335_v33 = vpop.f32.mrb[2].mxu1 }
 0x1d2   :  { %v254_v34 = vmax.f32 %v247_v29, 0.0  ;;  %v241_v36 = vpop.f32.mrb[3].mxu1 }
 0x1d3   :  { %v252_v37 = vmax.f32 %v239_v32, 0.0  ;;  %v242_v38 = vadd.f32 %v284_v27, %v241_v36 }
 0x1d4   :  { %v260_v39 = vadd.f32 %v257_v31, %v254_v34 }
 0x1d5   :  { %v258_v41 = vadd.f32 %v255_v35, %v252_v37  ;;  %v253_v42 = vmax.f32 %v242_v38, 0.0 }
 0x1d6   :  { %v263_v43 = vmax.f32 %v260_v39, 0.0 }
 0x1d7   :  { %v261_v44 = vmax.f32 %v258_v41, 0.0  ;;  %v259_v45 = vadd.f32 %v256_v40, %v253_v42 }
 0x1d8   :  { %267 = vst.msk [vmem:[%s456_s6 + $0x10] sm:$0xff] %vm264_vm3, %v263_v43 }
 0x1d9   :  { %265 = vst.msk [vmem:[%s456_s6] sm:$0xff] %vm264_vm3, %v261_v44  ;;  %v262_v46 = vmax.f32 %v259_v45, 0.0 }
 0x1db   :  { %266 = vst.msk [vmem:[%s456_s6 + $0x8] sm:$0xff] %vm264_vm3, %v262_v46 }

// kernel: net_forward.7
= control target key start
LH: loop header
LB: loop body
LE: loop exit
PB: predicated region body
PF: predicated region fallthrough
CT: control target
= control target key end

     0   :  { %v50_v34 = vlaneseq  ;;  %s503_s1 = inlined_call_operand.vmem [shape: bf16[256,256], index: 1, kind: input, shape index: {}]   ;;  %s504_s0 = inlined_call_operand.vmem [shape: bf16[16,256], index: 0, kind: input, shape index: {}]   ;;  %s505_s2 = inlined_call_operand.vmem [shape: f32[1,256], index: 2, kind: input, shape index: {}]   ;;  %s506_s3 = inlined_call_operand.vmem [shape: f32[16,256], index: 3, kind: output, shape index: {}]  }
   0x1   :  { %v315_v0 = vld [vmem:[%s503_s1 + $0x4] ss:$8 sps:$4 sm:$0xff]   ;;  %v317_v1 = vld [vmem:[%s503_s1] ss:$8 sps:$4 sm:$0xff]   ;;  %v318_v2 = vld [vmem:[%s503_s1 + $0x14] ss:$8 sps:$4 sm:$0xff]  }
   0x2   :  { %230 = vmatprep.subr.bf16.mxu0 %v315_v0  ;;  %v320_v3 = vld [vmem:[%s503_s1 + $0x10] ss:$8 sps:$4 sm:$0xff]   ;;  %v321_v4 = vld [vmem:[%s503_s1 + $0x24] ss:$8 sps:$4 sm:$0xff]   ;;  %v323_v5 = vld [vmem:[%s503_s1 + $0x20] ss:$8 sps:$4 sm:$0xff]  }
   0x3   :  { %231 = vmatpush1.bf16.msra.mxu0 %v317_v1  ;;  %v324_v6 = vld [vmem:[%s503_s1 + $0x34] ss:$8 sps:$4 sm:$0xff]   ;;  %v326_v7 = vld [vmem:[%s503_s1 + $0x30] ss:$8 sps:$4 sm:$0xff]   ;;  %v327_v8 = vld [vmem:[%s503_s1 + $0x44] ss:$8 sps:$4 sm:$0xff]  }
   0x4   :  { %232 = vmatprep.subr.bf16.mxu0 %v318_v2  ;;  %v329_v9 = vld [vmem:[%s503_s1 + $0x40] ss:$8 sps:$4 sm:$0xff]   ;;  %v330_v10 = vld [vmem:[%s503_s1 + $0x54] ss:$8 sps:$4 sm:$0xff]   ;;  %v332_v11 = vld [vmem:[%s503_s1 + $0x50] ss:$8 sps:$4 sm:$0xff]  }
   0x5   :  { %v333_v12 = vld [vmem:[%s503_s1 + $0x64] ss:$8 sps:$4 sm:$0xff]   ;;  %v335_v14 = vld [vmem:[%s503_s1 + $0x60] ss:$8 sps:$4 sm:$0xff]   ;;  %v336_v15 = vld [vmem:[%s503_s1 + $0x74] ss:$8 sps:$4 sm:$0xff]  }
   0x6   :  { %v365_v13 = vld [vmem:[%s504_s0 + $0x4] ss:$8 sps:$4 sm:$0xff]   ;;  %v338_v16 = vld [vmem:[%s503_s1 + $0x70] ss:$8 sps:$4 sm:$0xff]   ;;  %v341_v18 = vld [vmem:[%s503_s1 + $0x80] ss:$8 sps:$4 sm:$0xff]  }
   0x7   :  { %233 = vmatpush1.bf16.msra.mxu0 %v320_v3  ;;  %262 = vmatprep.mubr.bf16.mxu0 %v365_v13  ;;  %v339_v17 = vld [vmem:[%s503_s1 + $0x84] ss:$8 sps:$4 sm:$0xff]   ;;  %v342_v19 = vld [vmem:[%s503_s1 + $0x94] ss:$8 sps:$4 sm:$0xff]   ;;  %v344_v20 = vld [vmem:[%s503_s1 + $0x90] ss:$8 sps:$4 sm:$0xff]  }
   0x8   :  { %234 = vmatprep.subr.bf16.mxu0 %v321_v4  ;;  %v345_v21 = vld [vmem:[%s503_s1 + $0xa4] ss:$8 sps:$4 sm:$0xff]   ;;  %v347_v22 = vld [vmem:[%s503_s1 + $0xa0] ss:$8 sps:$4 sm:$0xff]   ;;  %v348_v23 = vld [vmem:[%s503_s1 + $0xb4] ss:$8 sps:$4 sm:$0xff]  }
   0x9   :  { %v350_v24 = vld [vmem:[%s503_s1 + $0xb0] ss:$8 sps:$4 sm:$0xff]   ;;  %v351_v25 = vld [vmem:[%s503_s1 + $0xc4] ss:$8 sps:$4 sm:$0xff]   ;;  %v353_v26 = vld [vmem:[%s503_s1 + $0xc0] ss:$8 sps:$4 sm:$0xff]  }
   0xa   :  { %v354_v27 = vld [vmem:[%s503_s1 + $0xd4] ss:$8 sps:$4 sm:$0xff]   ;;  %v356_v28 = vld [vmem:[%s503_s1 + $0xd0] ss:$8 sps:$4 sm:$0xff]   ;;  %v357_v29 = vld [vmem:[%s503_s1 + $0xe4] ss:$8 sps:$4 sm:$0xff]  }
   0xb   :  { %235 = vmatpush1.bf16.msra.mxu0 %v323_v5  ;;  %v359_v30 = vld [vmem:[%s503_s1 + $0xe0] ss:$8 sps:$4 sm:$0xff]   ;;  %v360_v31 = vld [vmem:[%s503_s1 + $0xf4] ss:$8 sps:$4 sm:$0xff]   ;;  %v362_v32 = vld [vmem:[%s503_s1 + $0xf0] ss:$8 sps:$4 sm:$0xff]  }
   0xc   :  { %236 = vmatprep.subr.bf16.mxu0 %v324_v6  ;;  %v363_v33 = vld [vmem:[%s504_s0] ss:$8 sps:$4 sm:$0xff]   ;;  %v51_v35 = vshrl.u32 %v50_v34, 7 }
   0xd   :  { %v48_v37 = vld [vmem:[%s505_s2] sm:$0x3] }
   0xe   :  { %v52_v36 = vsub.s32 0, %v51_v35  ;;  %v56_v38 = vsub.s32 1, %v51_v35 }
   0xf   :  { %237 = vmatpush1.bf16.msra.mxu0 %v326_v7 }
  0x10   :  { %238 = vmatprep.subr.bf16.mxu0 %v327_v8  ;;  %v53_v39 = vrot.slane %v48_v37, %v52_v36  ;;  %v57_v40 = vrot.slane %v48_v37, %v56_v38 }
  0x13   :  { %239 = vmatpush1.bf16.msra.mxu0 %v329_v9 }
  0x14   :  { %240 = vmatprep.subr.bf16.mxu0 %v330_v10 }
  0x17   :  { %241 = vmatpush1.bf16.msra.mxu0 %v332_v11 }
  0x18   :  { %242 = vmatprep.subr.bf16.mxu0 %v333_v12 }
  0x1b   :  { %243 = vmatpush1.bf16.msra.mxu0 %v335_v14 }
  0x1c   :  { %244 = vmatprep.subr.bf16.mxu0 %v336_v15 }
  0x1f   :  { %245 = vmatpush1.bf16.msra.mxu0 %v338_v16 }
  0x20   :  { %246 = vmatprep.subr.bf16.mxu0 %v339_v17 }
  0x23   :  { %247 = vmatpush1.bf16.msra.mxu0 %v341_v18 }
  0x24   :  { %248 = vmatprep.subr.bf16.mxu0 %v342_v19 }
  0x27   :  { %249 = vmatpush1.bf16.msra.mxu0 %v344_v20 }
  0x28   :  { %250 = vmatprep.subr.bf16.mxu0 %v345_v21 }
  0x2b   :  { %251 = vmatpush1.bf16.msra.mxu0 %v347_v22 }
  0x2c   :  { %252 = vmatprep.subr.bf16.mxu0 %v348_v23 }
  0x2f   :  { %253 = vmatpush1.bf16.msra.mxu0 %v350_v24 }
  0x30   :  { %254 = vmatprep.subr.bf16.mxu0 %v351_v25 }
  0x33   :  { %255 = vmatpush1.bf16.msra.mxu0 %v353_v26 }
  0x34   :  { %256 = vmatprep.subr.bf16.mxu0 %v354_v27 }
  0x37   :  { %257 = vmatpush1.bf16.msra.mxu0 %v356_v28 }
  0x38   :  { %258 = vmatprep.subr.bf16.mxu0 %v357_v29 }
  0x3b   :  { %259 = vmatpush1.bf16.msra.mxu0 %v359_v30 }
  0x3c   :  { %260 = vmatprep.subr.bf16.mxu0 %v360_v31 }
  0x3f   :  { %261 = vmatpush1.bf16.msra.mxu0 %v362_v32 }
  0x42   :  { %263 = vmatmul.mubr.bf16.vlgmr.msra.gmra.mrb[0].mxu0 %v363_v33 }
 0x115   :  { %v264_v41 = vpop.f32.mrb[0].mxu0 }
 0x116   :  { %v265_v42 = vadd.f32 %v264_v41, %v53_v39  ;;  %v266_v43 = vpop.f32.mrb[1].mxu0 }
 0x117   :  { %v267_v44 = vadd.f32 %v266_v43, %v57_v40  ;;  %v268_v45 = vpop.f32.mrb[2].mxu0 }
 0x118   :  { %273 = vst [vmem:[%s506_s3] sm:$0xff] %v265_v42  ;;  %v269_v46 = vadd.f32 %v268_v45, %v53_v39  ;;  %v270_v47 = vpop.f32.mrb[3].mxu0 }
 0x119   :  { %274 = vst [vmem:[%s506_s3 + $0x8] sm:$0xff] %v267_v44  ;;  %v271_v48 = vadd.f32 %v270_v47, %v57_v40 }
 0x11a   :  { %275 = vst [vmem:[%s506_s3 + $0x10] sm:$0xff] %v269_v46 }
 0x11b   :  { %276 = vst [vmem:[%s506_s3 + $0x18] sm:$0xff] %v271_v48 }

// kernel: net_forward.8
= control target key start
LH: loop header
LB: loop body
LE: loop exit
PB: predicated region body
PF: predicated region fallthrough
CT: control target
= control target key end

     0   :  { %s2017_s18 = smov 0   ;;  %s2019_s19 = smov 0   ;;  %s2689_s0 = inlined_call_operand.vmem [shape: f32[4,128,1], index: 0, kind: input, shape index: {}]   ;;  %s2690_s1 = inlined_call_operand.vmem [shape: f32[4,1,128], index: 1, kind: input, shape index: {}]   ;;  %s2691_s2 = inlined_call_operand.vmem [shape: bf16[1,128,128], index: 2, kind: input, shape index: {}]   ;;  %s2692_s3 = inlined_call_operand.vmem [shape: bf16[4,128,64], index: 3, kind: input, shape index: {}]   ;;  %s2693_s4 = inlined_call_operand.vmem [shape: f32[4,1,64], index: 4, kind: input, shape index: {}]   ;;  %s2694_s5 = inlined_call_operand.vmem [shape: f32[4,128,64], index: 5, kind: output, shape index: {}]  }
   0x1   :  { %s2021_s20 = smov 0  }
   0x2 LB: > { %s34_s21 = sadd.s32 1, %s1978_s19  ;;  %p1702_p0 = scmp.ge.s32.totalorder %s1982_s20, 1  ;;  %s1982_s20 = sphi %s2021_s20, %s15_s20   ;;  %s1978_s19 = sphi %s2019_s19, %s2742_s19   ;;  %s1974_s18 = sphi %s2017_s18, %s2741_s18  }
   0x3   : > { %p36_p1 = scmp.ge.s32.totalorder %s34_s21, 4  ;;  %p269_p2 = scmp.lt.s32.totalorder %s1982_s20, 5 }
   0x5   : > { %s2744_s21 = smov (%p36_p1, %s34_s21), 0  ;;  %p270_p3 = pnand %p1702_p0, %p269_p2 }
   0x6   : > { %p332_p4 = scmp.lt.s32.totalorder (!%p270_p3), %s1974_s18, 3  ;;  %v1984_v0 = vmov (!%p270_p3), 0   ;;  %vm384_vm0 = vcmask (!%p270_p3), 7168   ;;  %v1985_v17 = vmov (!%p270_p3), -1e+30   ;;  %v1725_v18 = vld [vmem:[%s2691_s2] sm:$0xff] (!%p270_p3)  }
   0x7   : > { %273 = sbr.rel (%p270_p3) target bundleno = 784 (0x310), region = 40  ;;  %1855 = vset.pattern.permute.xlu1 (!%p270_p3), %v1984_v0  ;;  %1854 = vset.pattern.permute.xlu0 (!%p270_p3), %v1984_v0  ;;  %385 = vst.msk [vmem:[#allocation2] sm:$0xff] (!%p270_p3), %vm384_vm0, %v1985_v17  ;;  %386 = vst.msk [vmem:[#allocation2 + $0x8] sm:$0xff] (!%p270_p3), %vm384_vm0, %v1985_v17  ;;  %v1726_v20 = vunpack.c.l.bf16 (!%p270_p3), %v1725_v18  ;;  %v1759_v21 = vld [vmem:[%s2691_s2 + $0x20] sm:$0xff] (!%p270_p3)   ;;  %v1727_v27 = vunpack.c.h.bf16 (!%p270_p3), %v1725_v18  ;;  %v1756_v30 = vld [vmem:[%s2691_s2 + $0x8] sm:$0xff] (!%p270_p3)  }
   0x8   : > { %387 = vst.msk [vmem:[#allocation2 + $0x10] sm:$0xff] (!%p270_p3), %vm384_vm0, %v1985_v17  ;;  %388 = vst.msk [vmem:[#allocation2 + $0x18] sm:$0xff] (!%p270_p3), %vm384_vm0, %v1985_v17  ;;  %v1742_v26 = vunpack.c.l.bf16 (!%p270_p3), %v1759_v21  ;;  %v1743_v36 = vunpack.c.h.bf16 (!%p270_p3), %v1759_v21  ;;  %v1730_v40 = vunpack.c.l.bf16 (!%p270_p3), %v1756_v30  ;;  %v1760_v44 = vld [vmem:[%s2691_s2 + $0x28] sm:$0xff] (!%p270_p3)   ;;  %v1731_v47 = vunpack.c.h.bf16 (!%p270_p3), %v1756_v30  ;;  %v1757_v59 = vld [vmem:[%s2691_s2 + $0x10] sm:$0xff] (!%p270_p3)  }
   0x9   : > { %389 = vst.msk [vmem:[#allocation2 + $0x20] sm:$0xff] (!%p270_p3), %vm384_vm0, %v1985_v17  ;;  %390 = vst.msk [vmem:[#allocation2 + $0x28] sm:$0xff] (!%p270_p3), %vm384_vm0, %v1985_v17  ;;  %vm633_vm1 = vcmp.gt.f32.partialorder (!%p270_p3), %v1726_v20, 0.0  ;;  %vm2084_vm5 = vcmp.gt.f32.partialorder (!%p270_p3), %v1727_v27, 0.0  ;;  %v1746_v55 = vunpack.c.l.bf16 (!%p270_p3), %v1760_v44 }
   0xa   : > { %391 = vst.msk [vmem:[#allocation2 + $0x30] sm:$0xff] (!%p270_p3), %vm384_vm0, %v1985_v17  ;;  %392 = vst.msk [vmem:[#allocation2 + $0x38] sm:$0xff] (!%p270_p3), %vm384_vm0, %v1985_v17  ;;  %vm2080_vm4 = vcmp.gt.f32.partialorder (!%p270_p3), %v1742_v26, 0.0  ;;  %vm2094_vm8 = vcmp.gt.f32.partialorder (!%p270_p3), %v1743_v36, 0.0  ;;  %vm2106_vm9 = vcmp.gt.f32.partialorder (!%p270_p3), %v1730_v40, 0.0  ;;  %vm2115_vm12 = vcmp.gt.f32.partialorder (!%p270_p3), %v1731_v47, 0.0 }
   0xb   : > { %393 = vst.msk [vmem:[#allocation2 + $0x40] sm:$0xff] (!%p270_p3), %vm384_vm0, %v1985_v17  ;;  %394 = vst.msk [vmem:[#allocation2 + $0x48] sm:$0xff] (!%p270_p3), %vm384_vm0, %v1985_v17  ;;  %vm2129_vm13 = vcmp.gt.f32.partialorder (!%p270_p3), %v1746_v55, 0.0  ;;  %v1758_v26 = vld [vmem:[%s2691_s2 + $0x18] sm:$0xff] (!%p270_p3)  }
   0xc   : > { %395 = vst.msk [vmem:[#allocation2 + $0x50] sm:$0xff] (!%p270_p3), %vm384_vm0, %v1985_v17  ;;  %396 = vst.msk [vmem:[#allocation2 + $0x58] sm:$0xff] (!%p270_p3), %vm384_vm0, %v1985_v17  ;;  %v1738_v38 = vunpack.c.l.bf16 (!%p270_p3), %v1758_v26 }
   0xd   : > { %397 = vst.msk [vmem:[#allocation2 + $0x60] sm:$0xff] (!%p270_p3), %vm384_vm0, %v1985_v17  ;;  %398 = vst.msk [vmem:[#allocation2 + $0x68] sm:$0xff] (!%p270_p3), %vm384_vm0, %v1985_v17 }
   0xe   : > { %s2746_s18 = smov (!%p332_p4, %s1974_s18), 3  ;;  %399 = vst.msk [vmem:[#allocation2 + $0x70] sm:$0xff] %vm384_vm0, %v1985_v17  ;;  %400 = vst.msk [vmem:[#allocation2 + $0x78] sm:$0xff] %vm384_vm0, %v1985_v17 }
   0xf   : > { %s1721_s22 = sshll.u32 %s2746_s18, 7  ;;  %s346_s28 = scalar_lea.vmem %s2690_s1, %s2746_s18 }
  0x10   : > { %s339_s25 = scalar_lea.vmem %s2689_s0, %s1721_s22  ;;  %v2066_v19 = vld [vmem:[%s346_s28] ss:$0 sm:$0xff]  ;;  %s368_s6 = scalar_lea.vmem %s2693_s4, %s2746_s18 }
  0x11   : > { %v442_v1 = vld [vmem:[%s339_s25 + $0x40] sm:$0xff]  ;;  %v443_v3 = vld [vmem:[%s339_s25 + $0x48] sm:$0xff]  ;;  %v437_v5 = vld [vmem:[%s339_s25 + $0x18] sm:$0xff]  ;;  %s2631_s9 = scalar_lea.vmem %s2694_s5, %s1721_s22 }
  0x12   : > { %v434_v2 = vld [vmem:[%s339_s25] sm:$0xff]  ;;  %493 = vperm.xlu1 %1855, %v442_v1   ;;  %v435_v4 = vld [vmem:[%s339_s25 + $0x8] sm:$0xff]  ;;  %v436_v6 = vld [vmem:[%s339_s25 + $0x10] sm:$0xff] }
  0x13   : > { %453 = vperm.xlu0 %1854, %v434_v2   ;;  %v445_v7 = vld [vmem:[%s339_s25 + $0x58] sm:$0xff]  ;;  %v444_v8 = vld [vmem:[%s339_s25 + $0x50] sm:$0xff]  ;;  %v439_v9 = vld [vmem:[%s339_s25 + $0x28] sm:$0xff]  ;;  %v1747_v2 = vunpack.c.h.bf16 %v1760_v44 }
  0x14   : > { %v438_v10 = vld [vmem:[%s339_s25 + $0x20] sm:$0xff]  ;;  %v447_v11 = vld [vmem:[%s339_s25 + $0x68] sm:$0xff]  ;;  %v441_v13 = vld [vmem:[%s339_s25 + $0x38] sm:$0xff] }
  0x15   : > { %v446_v12 = vld [vmem:[%s339_s25 + $0x60] sm:$0xff]  ;;  %v440_v14 = vld [vmem:[%s339_s25 + $0x30] sm:$0xff]  ;;  %v449_v15 = vld [vmem:[%s339_s25 + $0x78] sm:$0xff] }
  0x16   : > { %498 = vperm.xlu1 %1855, %v443_v3   ;;  %v448_v16 = vld [vmem:[%s339_s25 + $0x70] sm:$0xff]  ;;  %s1722_s25 = sshll.u32 %s2746_s18, 6 }
  0x17   : > { %458 = vperm.xlu0 %1854, %v435_v4   ;;  %s2274_s28 = scalar_lea.vmem %s2692_s3, %s1722_s25 }
  0x18   : > { %v1858_v36 = vld [vmem:[%s2274_s28 + $0x10] sm:$0xff]  }
  0x1a   : > { %468 = vperm.xlu1 %1855, %v437_v5  }
  0x1b   : > { %463 = vperm.xlu0 %1854, %v436_v6   ;;  %v1734_v6 = vunpack.c.l.bf16 %v1757_v59 }
  0x1e   : > { %508 = vperm.xlu1 %1855, %v445_v7  }
  0x1f   : > { %503 = vperm.xlu0 %1854, %v444_v8  }
  0x22   : > { %478 = vperm.xlu1 %1855, %v439_v9  }
  0x23   : > { %473 = vperm.xlu0 %1854, %v438_v10   ;;  %v1761_v10 = vld [vmem:[%s2691_s2 + $0x30] sm:$0xff]  }
  0x26   : > { %518 = vperm.xlu1 %1855, %v447_v11  }
  0x27   : > { %513 = vperm.xlu0 %1854, %v446_v12  }
  0x2a   : > { %488 = vperm.xlu1 %1855, %v441_v13   ;;  %v1735_v13 = vunpack.c.h.bf16 %v1757_v59 }
  0x2b   : > { %483 = vperm.xlu0 %1854, %v440_v14  }
  0x2e   : > { %528 = vperm.xlu1 %1855, %v449_v15  }
  0x2f   : > { %523 = vperm.xlu0 %1854, %v448_v16  }
  0x91   : > { %v494_v22 = vpop.permute.xlu1 %493 }
  0x92   : > { %v454_v23 = vpop.permute.xlu0 %453  ;;  %v545_v24 = vadd.f32 %v2066_v19, %v494_v22  ;;  %v1750_v22 = vunpack.c.l.bf16 %v1761_v10 }
  0x93   : > { %v537_v25 = vadd.f32 %v2066_v19, %v454_v23 }
  0x94   : > { %v577_v28 = vmul.f32 0.2, %v545_v24  ;;  %vm561_vm3 = vcmp.ge.f32.partialorder %v545_v24, 0.0 }
  0x95   : > { %v569_v29 = vmul.f32 0.2, %v537_v25  ;;  %vm553_vm2 = vcmp.ge.f32.partialorder %v537_v25, 0.0  ;;  %v499_v31 = vpop.permute.xlu1 %498 }
  0x96   : > { %v459_v32 = vpop.permute.xlu0 %458  ;;  %v546_v33 = vadd.f32 %v2066_v19, %v499_v31  ;;  %v593_v43 = vsel %vm561_vm3, %v545_v24, %v577_v28 }
  0x97   : > { %v538_v34 = vadd.f32 %v2066_v19, %v459_v32  ;;  %v585_v35 = vsel %vm553_vm2, %v537_v25, %v569_v29  ;;  %v2100_v52 = vsel %vm2080_vm4, %v593_v43, -1e+30  ;;  %vm2152_vm2 = vcmp.gt.f32.partialorder %v1734_v6, 0.0 }
  0x98   : > { %v2078_v37 = vsel %vm633_vm1, %v585_v35, -1e+30  ;;  %v578_v41 = vmul.f32 0.2, %v546_v33  ;;  %vm562_vm7 = vcmp.ge.f32.partialorder %v546_v33, 0.0  ;;  %vm2140_vm1 = vcmp.gt.f32.partialorder %v1747_v2, 0.0 }
  0x99   : > { %v570_v42 = vmul.f32 0.2, %v538_v34  ;;  %681 = vmax.xlane.f32.xlu0 %v2078_v37  ;;  %vm554_vm6 = vcmp.ge.f32.partialorder %v538_v34, 0.0  ;;  %v469_v45 = vpop.permute.xlu1 %468 }
  0x9a   : > { %v464_v46 = vpop.permute.xlu0 %463  ;;  %v540_v48 = vadd.f32 %v2066_v19, %v469_v45  ;;  %v594_v58 = vsel %vm562_vm7, %v546_v33, %v578_v41  ;;  %v1751_v33 = vunpack.c.h.bf16 %v1761_v10  ;;  %v1739_v45 = vunpack.c.h.bf16 %v1758_v26 }
  0x9b   : > { %v539_v49 = vadd.f32 %v2066_v19, %v464_v46  ;;  %v586_v50 = vsel %vm554_vm6, %v538_v34, %v570_v42  ;;  %v2123_v3 = vsel %vm2094_vm8, %v594_v58, -1e+30  ;;  %vm2175_vm6 = vcmp.gt.f32.partialorder %v1750_v22, 0.0  ;;  %v1762_v42 = vld [vmem:[%s2691_s2 + $0x38] sm:$0xff]   ;;  %v2282_v22 = vld [vmem:[#allocation2 + $0x8] sm:$0xff] }
  0x9c   : > { %v2104_v53 = vsel %vm2084_vm5, %v586_v50, -1e+30  ;;  %v572_v56 = vmul.f32 0.2, %v540_v48  ;;  %vm556_vm11 = vcmp.ge.f32.partialorder %v540_v48, 0.0  ;;  %vm2161_vm5 = vcmp.gt.f32.partialorder %v1735_v13, 0.0 }
  0x9d   : > { %v571_v57 = vmul.f32 0.2, %v539_v49  ;;  %697 = vmax.xlane.f32.xlu0 %v2100_v52  ;;  %683 = vmax.xlane.f32.xlu1 %v2104_v53  ;;  %vm555_vm10 = vcmp.ge.f32.partialorder %v539_v49, 0.0  ;;  %v509_v60 = vpop.permute.xlu1 %508  ;;  %v1754_v55 = vunpack.c.l.bf16 %v1762_v42 }
  0x9e   : > { %v504_v61 = vpop.permute.xlu0 %503  ;;  %v548_v63 = vadd.f32 %v2066_v19, %v509_v60  ;;  %v588_v9 = vsel %vm556_vm11, %v540_v48, %v572_v56 }
  0x9f   : > { %v547_v0 = vadd.f32 %v2066_v19, %v504_v61  ;;  %v587_v1 = vsel %vm555_vm10, %v539_v49, %v571_v57  ;;  %v2146_v18 = vsel %vm2115_vm12, %v588_v9, -1e+30  ;;  %vm2198_vm10 = vcmp.gt.f32.partialorder %v1738_v38, 0.0 }
  0xa0   : > { %v2127_v4 = vsel %vm2106_vm9, %v587_v1, -1e+30  ;;  %v580_v7 = vmul.f32 0.2, %v548_v63  ;;  %vm564_vm15 = vcmp.ge.f32.partialorder %v548_v63, 0.0  ;;  %vm2186_vm9 = vcmp.gt.f32.partialorder %v1751_v33, 0.0 }
  0xa1   : > { %v579_v8 = vmul.f32 0.2, %v547_v0  ;;  %699 = vmax.xlane.f32.xlu0 %v2123_v3  ;;  %685 = vmax.xlane.f32.xlu1 %v2127_v4  ;;  %vm563_vm14 = vcmp.ge.f32.partialorder %v547_v0, 0.0  ;;  %v479_v11 = vpop.permute.xlu1 %478  ;;  %v1755_v1 = vunpack.c.h.bf16 %v1762_v42  ;;  %v2695_v9 = vmov 0.0   ;;  %v2319_v42 = vld [vmem:[#allocation2 + $0x50] sm:$0xff] }
  0xa2   : > { %v474_v12 = vpop.permute.xlu0 %473  ;;  %v542_v14 = vadd.f32 %v2066_v19, %v479_v11  ;;  %v596_v25 = vsel %vm564_vm15, %v548_v63, %v580_v7  ;;  %401 = vst.msk [vmem:[#allocation3] sm:$0xff] %vm384_vm0, %v2695_v9  ;;  %402 = vst.msk [vmem:[#allocation3 + $0x8] sm:$0xff] %vm384_vm0, %v2695_v9 }
  0xa3   : > { %v541_v15 = vadd.f32 %v2066_v19, %v474_v12  ;;  %v595_v16 = vsel %vm563_vm14, %v547_v0, %v579_v8  ;;  %v2169_v34 = vsel %vm2140_vm1, %v596_v25, -1e+30  ;;  %vm2218_vm14 = vcmp.gt.f32.partialorder %v1754_v55, 0.0  ;;  %403 = vst.msk [vmem:[#allocation3 + $0x10] sm:$0xff] %vm384_vm0, %v2695_v9  ;;  %404 = vst.msk [vmem:[#allocation3 + $0x18] sm:$0xff] %vm384_vm0, %v2695_v9  ;;  %v1857_v25 = vld [vmem:[%s2274_s28 + $0x8] sm:$0xff]  }
  0xa4   : > { %v2150_v20 = vsel %vm2129_vm13, %v595_v16, -1e+30  ;;  %v574_v23 = vmul.f32 0.2, %v542_v14  ;;  %vm558_vm4 = vcmp.ge.f32.partialorder %v542_v14, 0.0  ;;  %vm2204_vm13 = vcmp.gt.f32.partialorder %v1739_v45, 0.0 }
  0xa5   : > { %v573_v24 = vmul.f32 0.2, %v541_v15  ;;  %687 = vmax.xlane.f32.xlu0 %v2146_v18  ;;  %701 = vmax.xlane.f32.xlu1 %v2150_v20  ;;  %vm557_vm3 = vcmp.ge.f32.partialorder %v541_v15, 0.0  ;;  %v519_v27 = vpop.permute.xlu1 %518  ;;  %405 = vst.msk [vmem:[#allocation3 + $0x20] sm:$0xff] %vm384_vm0, %v2695_v9  ;;  %406 = vst.msk [vmem:[#allocation3 + $0x28] sm:$0xff] %vm384_vm0, %v2695_v9  ;;  %v2277_v16 = vld [vmem:[#allocation2] sm:$0xff] }
  0xa6   : > { %v514_v28 = vpop.permute.xlu0 %513  ;;  %v550_v30 = vadd.f32 %v2066_v19, %v519_v27  ;;  %v590_v41 = vsel %vm558_vm4, %v542_v14, %v574_v23  ;;  %407 = vst.msk [vmem:[#allocation3 + $0x30] sm:$0xff] %vm384_vm0, %v2695_v9  ;;  %408 = vst.msk [vmem:[#allocation3 + $0x38] sm:$0xff] %vm384_vm0, %v2695_v9  ;;  %v2284_v23 = vld [vmem:[#allocation2 + $0x40] sm:$0xff] }
  0xa7   : > { %v549_v31 = vadd.f32 %v2066_v19, %v514_v28  ;;  %v589_v32 = vsel %vm557_vm3, %v541_v15, %v573_v24  ;;  %v2192_v50 = vsel %vm2161_vm5, %v590_v41, -1e+30  ;;  %409 = vst.msk [vmem:[#allocation3 + $0x40] sm:$0xff] %vm384_vm0, %v2695_v9  ;;  %410 = vst.msk [vmem:[#allocation3 + $0x48] sm:$0xff] %vm384_vm0, %v2695_v9  ;;  %v1856_v15 = vld [vmem:[%s2274_s28] sm:$0xff]   ;;  %vm417_vm3 = vcmask 523264  }
  0xa8   : > { %v2173_v35 = vsel %vm2152_vm2, %v589_v32, -1e+30  ;;  %v582_v39 = vmul.f32 0.2, %v550_v30  ;;  %vm566_vm8 = vcmp.ge.f32.partialorder %v550_v30, 0.0  ;;  %411 = vst.msk [vmem:[#allocation3 + $0x50] sm:$0xff] %vm384_vm0, %v2695_v9  ;;  %1779 = vmatprep.subr.bf16.mxu0 %v1856_v15  ;;  %1811 = vmatprep.subr.bf16.mxu1 %v1856_v15 }
  0xa9   : > { %v581_v40 = vmul.f32 0.2, %v549_v31  ;;  %703 = vmax.xlane.f32.xlu0 %v2169_v34  ;;  %689 = vmax.xlane.f32.xlu1 %v2173_v35  ;;  %vm565_vm7 = vcmp.ge.f32.partialorder %v549_v31, 0.0  ;;  %v489_v43 = vpop.permute.xlu1 %488  ;;  %412 = vst.msk [vmem:[#allocation3 + $0x58] sm:$0xff] %vm384_vm0, %v2695_v9  ;;  %413 = vst.msk [vmem:[#allocation3 + $0x60] sm:$0xff] %vm384_vm0, %v2695_v9  ;;  %vm648_vm2 = vcmp.gt.f32.partialorder %v1755_v1, 0.0 }
  0xaa   : > { %v484_v44 = vpop.permute.xlu0 %483  ;;  %v544_v46 = vadd.f32 %v2066_v19, %v489_v43  ;;  %v598_v58 = vsel %vm566_vm8, %v550_v30, %v582_v39  ;;  %414 = vst.msk [vmem:[#allocation3 + $0x68] sm:$0xff] %vm384_vm0, %v2695_v9  ;;  %415 = vst.msk [vmem:[#allocation3 + $0x70] sm:$0xff] %vm384_vm0, %v2695_v9  ;;  %1780 = vmatpush3.bf16.msra.mxu0 %v1856_v15  ;;  %1819 = vmatpush3.bf16.msra.mxu1 %v1856_v15  ;;  %v2298_v30 = vld [vmem:[#allocation2 + $0x10] sm:$0xff]  ;;  %v2321_v43 = vld [vmem:[#allocation2 + $0x18] sm:$0xff] }
  0xab   : > { %v543_v47 = vadd.f32 %v2066_v19, %v484_v44  ;;  %v597_v48 = vsel %vm565_vm7, %v549_v31, %v581_v40  ;;  %v2212_v2 = vsel %vm2186_vm9, %v598_v58, -1e+30  ;;  %416 = vst.msk [vmem:[#allocation3 + $0x78] sm:$0xff] %vm384_vm0, %v2695_v9  ;;  %1781 = vmatprep.subr.bf16.mxu0 %v1857_v25  ;;  %1812 = vmatprep.subr.bf16.mxu1 %v1857_v25  ;;  %v2300_v31 = vld [vmem:[#allocation2 + $0x48] sm:$0xff]  ;;  %v2340_v55 = vld [vmem:[#allocation2 + $0x20] sm:$0xff] }
  0xac   : > { %v2196_v51 = vsel %vm2175_vm6, %v597_v48, -1e+30  ;;  %v576_v56 = vmul.f32 0.2, %v544_v46  ;;  %vm560_vm12 = vcmp.ge.f32.partialorder %v544_v46, 0.0  ;;  %v2363_v1 = vld [vmem:[#allocation2 + $0x28] sm:$0xff] }
  0xad   : > { %v575_v57 = vmul.f32 0.2, %v543_v47  ;;  %691 = vmax.xlane.f32.xlu0 %v2192_v50  ;;  %705 = vmax.xlane.f32.xlu1 %v2196_v51  ;;  %vm559_vm11 = vcmp.ge.f32.partialorder %v543_v47, 0.0  ;;  %v529_v59 = vpop.permute.xlu1 %528 }
  0xae   : > { %v524_v60 = vpop.permute.xlu0 %523  ;;  %v552_v62 = vadd.f32 %v2066_v19, %v529_v59  ;;  %1782 = vmatpush3.bf16.msra.mxu0 %v1857_v25  ;;  %1820 = vmatpush3.bf16.msra.mxu1 %v1857_v25  ;;  %v1860_v59 = vld [vmem:[%s2274_s28 + $0x20] sm:$0xff]   ;;  %v2384_v25 = vld [vmem:[#allocation2 + $0x68] sm:$0xff] }
  0xaf   : > { %v551_v63 = vadd.f32 %v2066_v19, %v524_v60  ;;  %v591_v0 = vsel %vm559_vm11, %v543_v47, %v575_v57  ;;  %v592_v19 = vsel %vm560_vm12, %v544_v46, %v576_v56  ;;  %1783 = vmatprep.subr.bf16.mxu0 %v1858_v36  ;;  %1813 = vmatprep.subr.bf16.mxu1 %v1858_v36  ;;  %v1859_v46 = vld [vmem:[%s2274_s28 + $0x18] sm:$0xff]  }
  0xb0   : > { %v2216_v5 = vsel %vm2198_vm10, %v591_v0, -1e+30  ;;  %v584_v7 = vmul.f32 0.2, %v552_v62  ;;  %vm568_vm1 = vcmp.ge.f32.partialorder %v552_v62, 0.0  ;;  %v2342_v56 = vld [vmem:[#allocation2 + $0x58] sm:$0xff] }
  0xb1   : > { %v583_v8 = vmul.f32 0.2, %v551_v63  ;;  %707 = vmax.xlane.f32.xlu0 %v2212_v2  ;;  %693 = vmax.xlane.f32.xlu1 %v2216_v5  ;;  %vm567_vm15 = vcmp.ge.f32.partialorder %v551_v63, 0.0  ;;  %v2259_v11 = vsel %vm2204_vm13, %v592_v19, -1e+30  ;;  %v2361_v0 = vld [vmem:[#allocation2 + $0x60] sm:$0xff] }
  0xb2   : > { %v600_v13 = vsel %vm568_vm1, %v552_v62, %v584_v7  ;;  %1784 = vmatpush3.bf16.msra.mxu0 %v1858_v36  ;;  %1821 = vmatpush3.bf16.msra.mxu1 %v1858_v36  ;;  %v1862_v36 = vld [vmem:[%s2274_s28 + $0x30] sm:$0xff]  }
  0xb3   : > { %v599_v10 = vsel %vm567_vm15, %v551_v63, %v583_v8  ;;  %v2267_v14 = vsel %vm648_vm2, %v600_v13, -1e+30  ;;  %1785 = vmatprep.subr.bf16.mxu0 %v1859_v46  ;;  %1814 = vmatprep.subr.bf16.mxu1 %v1859_v46  ;;  %v1861_v8 = vld [vmem:[%s2274_s28 + $0x28] sm:$0xff]  }
  0xb4   : > { %v2263_v12 = vsel %vm2218_vm14, %v599_v10, -1e+30 }
  0xb5   : > { %695 = vmax.xlane.f32.xlu0 %v2259_v11  ;;  %709 = vmax.xlane.f32.xlu1 %v2263_v12 }
  0xb6   : > { %1786 = vmatpush3.bf16.msra.mxu0 %v1859_v46  ;;  %1822 = vmatpush3.bf16.msra.mxu1 %v1859_v46 }
  0xb7   : > { %1787 = vmatprep.subr.bf16.mxu0 %v1860_v59  ;;  %1815 = vmatprep.subr.bf16.mxu1 %v1860_v59 }
  0xb9   : > { %711 = vmax.xlane.f32.xlu0 %v2267_v14 }
  0xba   : > { %1788 = vmatpush3.bf16.msra.mxu0 %v1860_v59  ;;  %1823 = vmatpush3.bf16.msra.mxu1 %v1860_v59  ;;  %v2405_v59 = vld [vmem:[#allocation2 + $0x38] sm:$0xff] }
  0xbb   : > { %1789 = vmatprep.subr.bf16.mxu0 %v1861_v8  ;;  %1816 = vmatprep.subr.bf16.mxu1 %v1861_v8 }
  0xbe   : > { %1790 = vmatpush3.bf16.msra.mxu0 %v1861_v8  ;;  %1824 = vmatpush3.bf16.msra.mxu1 %v1861_v8  ;;  %v1863_v8 = vld [vmem:[%s2274_s28 + $0x38] sm:$0xff]  }
  0xbf   : > { %1791 = vmatprep.subr.bf16.mxu0 %v1862_v36  ;;  %1817 = vmatprep.subr.bf16.mxu1 %v1862_v36 }
  0xc2   : > { %1792 = vmatpush3.bf16.msra.mxu0 %v1862_v36  ;;  %1825 = vmatpush3.bf16.msra.mxu1 %v1862_v36 }
  0xc3   : > { %1793 = vmatprep.subr.bf16.mxu0 %v1863_v8  ;;  %1818 = vmatprep.subr.bf16.mxu1 %v1863_v8 }
  0xc6   : > { %1794 = vmatpush3.bf16.msra.mxu0 %v1863_v8  ;;  %1826 = vmatpush3.bf16.msra.mxu1 %v1863_v8 }
 0x126   : > { %v682_v17 = vpop.xlane.xlu0 %681 }
 0x127   : > { %v2280_v21 = vmax.f32 %v2277_v16, %v682_v17  ;;  %v2382_v17 = vld [vmem:[#allocation2 + $0x30] sm:$0xff] }
 0x129   : > { %v729_v24 = vsub.f32 %v2277_v16, %v2280_v21  ;;  %1316 = vst.msk [vmem:[#allocation2] sm:$0xff] %vm384_vm0, %v2280_v21  ;;  %779 = vperm.xlu1 %1855, %v2280_v21  }
 0x12a   : > { %v684_v26 = vpop.xlane.xlu1 %683  ;;  %v698_v27 = vpop.xlane.xlu0 %697 }
 0x12b   : > { %v2293_v28 = vmax.f32 %v2282_v22, %v684_v26  ;;  %v2296_v29 = vmax.f32 %v2284_v23, %v698_v27 }
 0x12d   : > { %1317 = vst.msk [vmem:[#allocation2 + $0x8] sm:$0xff] %vm384_vm0, %v2293_v28  ;;  %1324 = vst.msk [vmem:[#allocation2 + $0x40] sm:$0xff] %vm384_vm0, %v2296_v29  ;;  %784 = vperm.xlu0 %1854, %v2293_v28   ;;  %819 = vperm.xlu1 %1855, %v2296_v29  }
 0x12e   : > { %v686_v38 = vpop.xlane.xlu1 %685  ;;  %v700_v39 = vpop.xlane.xlu0 %699 }
 0x12f   : > { %v2314_v40 = vmax.f32 %v2298_v30, %v686_v38  ;;  %v2317_v41 = vmax.f32 %v2300_v31, %v700_v39 }
 0x131   : > { %1318 = vst.msk [vmem:[#allocation2 + $0x10] sm:$0xff] %vm384_vm0, %v2314_v40  ;;  %1325 = vst.msk [vmem:[#allocation2 + $0x48] sm:$0xff] %vm384_vm0, %v2317_v41  ;;  %789 = vperm.xlu0 %1854, %v2314_v40   ;;  %824 = vperm.xlu1 %1855, %v2317_v41  }
 0x132   : > { %v702_v47 = vpop.xlane.xlu1 %701  ;;  %v688_v48 = vpop.xlane.xlu0 %687 }
 0x133   : > { %v2335_v49 = vmax.f32 %v2319_v42, %v702_v47  ;;  %v2338_v54 = vmax.f32 %v2321_v43, %v688_v48  ;;  %v2403_v48 = vld [vmem:[#allocation2 + $0x70] sm:$0xff] }
 0x135   : > { %1326 = vst.msk [vmem:[#allocation2 + $0x50] sm:$0xff] %vm384_vm0, %v2335_v49  ;;  %1319 = vst.msk [vmem:[#allocation2 + $0x18] sm:$0xff] %vm384_vm0, %v2338_v54  ;;  %829 = vperm.xlu0 %1854, %v2335_v49   ;;  %794 = vperm.xlu1 %1855, %v2338_v54  }
 0x136   : > { %v690_v60 = vpop.xlane.xlu1 %689  ;;  %v704_v61 = vpop.xlane.xlu0 %703 }
 0x137   : > { %v2356_v62 = vmax.f32 %v2340_v55, %v690_v60  ;;  %v2359_v63 = vmax.f32 %v2342_v56, %v704_v61 }
 0x139   : > { %1320 = vst.msk [vmem:[#allocation2 + $0x20] sm:$0xff] %vm384_vm0, %v2356_v62  ;;  %1327 = vst.msk [vmem:[#allocation2 + $0x58] sm:$0xff] %vm384_vm0, %v2359_v63  ;;  %799 = vperm.xlu0 %1854, %v2356_v62   ;;  %834 = vperm.xlu1 %1855, %v2359_v63   ;;  %v2729_v16 = vsub.f32 %v2340_v55, %v2356_v62  ;;  %v2733_v55 = vsub.f32 %v2284_v23, %v2296_v29 }
 0x13a   : > { %v706_v19 = vpop.xlane.xlu1 %705  ;;  %v692_v10 = vpop.xlane.xlu0 %691  ;;  %v2736_v23 = vsub.f32 %v2342_v56, %v2359_v63 }
 0x13b   : > { %v2377_v13 = vmax.f32 %v2361_v0, %v706_v19  ;;  %v2380_v15 = vmax.f32 %v2363_v1, %v692_v10  ;;  %v753_v21 = vmul.f32 1.442695, %v2729_v16  ;;  %v761_v62 = vmul.f32 1.442695, %v2733_v55  ;;  %v912_v55 = vld [vmem:[#allocation3 + $0x38] sm:$0xff] }
 0x13c   : > { %v767_v29 = vmul.f32 1.442695, %v2736_v23 }
 0x13d   : > { %1328 = vst.msk [vmem:[#allocation2 + $0x60] sm:$0xff] %vm384_vm0, %v2377_v13  ;;  %1321 = vst.msk [vmem:[#allocation2 + $0x28] sm:$0xff] %vm384_vm0, %v2380_v15  ;;  %839 = vperm.xlu0 %1854, %v2377_v13   ;;  %804 = vperm.xlu1 %1855, %v2380_v15  }
 0x13e   : > { %v694_v38 = vpop.xlane.xlu1 %693  ;;  %v708_v39 = vpop.xlane.xlu0 %707 }
 0x13f   : > { %v2398_v46 = vmax.f32 %v2382_v17, %v694_v38  ;;  %v2401_v47 = vmax.f32 %v2384_v25, %v708_v39  ;;  %v2424_v39 = vld [vmem:[#allocation2 + $0x78] sm:$0xff] }
 0x141   : > { %1322 = vst.msk [vmem:[#allocation2 + $0x30] sm:$0xff] %vm384_vm0, %v2398_v46  ;;  %1329 = vst.msk [vmem:[#allocation2 + $0x68] sm:$0xff] %vm384_vm0, %v2401_v47  ;;  %809 = vperm.xlu0 %1854, %v2398_v46   ;;  %844 = vperm.xlu1 %1855, %v2401_v47  }
 0x142   : > { %v710_v19 = vpop.xlane.xlu1 %709  ;;  %v696_v10 = vpop.xlane.xlu0 %695 }
 0x143   : > { %v2419_v36 = vmax.f32 %v2403_v48, %v710_v19  ;;  %v2422_v38 = vmax.f32 %v2405_v59, %v696_v10 }
 0x145   : > { %1330 = vst.msk [vmem:[#allocation2 + $0x70] sm:$0xff] %vm384_vm0, %v2419_v36  ;;  %1323 = vst.msk [vmem:[#allocation2 + $0x38] sm:$0xff] %vm384_vm0, %v2422_v38  ;;  %849 = vperm.xlu0 %1854, %v2419_v36   ;;  %814 = vperm.xlu1 %1855, %v2422_v38   ;;  %v2739_v63 = vsub.f32 %v2403_v48, %v2419_v36 }
 0x146   : > { %v712_v19 = vpop.xlane.xlu0 %711 }
 0x147   : > { %v2437_v10 = vmax.f32 %v2424_v39, %v712_v19 }
 0x149   : > { %1331 = vst.msk [vmem:[#allocation2 + $0x78] sm:$0xff] %vm384_vm0, %v2437_v10  ;;  %854 = vperm.xlu1 %1855, %v2437_v10  }
 0x1a8   : > { %v780_v61 = vpop.permute.xlu1 %779 }
 0x1a9   : > { %v857_v7 = vsub.f32 %v2078_v37, %v780_v61 }
 0x1ab   : > { %v873_v57 = vmul.f32 1.442695, %v857_v7 }
 0x1ac   : > { %v820_v45 = vpop.permute.xlu1 %819  ;;  %v785_v33 = vpop.permute.xlu0 %784 }
 0x1ad   : > { %1864 = vpow2.f32 %v873_v57  ;;  %v865_v26 = vsub.f32 %v2100_v52, %v820_v45  ;;  %v858_v19 = vsub.f32 %v2104_v53, %v785_v33 }
 0x1af   : > { %v875_v60 = vmul.f32 1.442695, %v858_v19  ;;  %v889_v27 = vmul.f32 1.442695, %v865_v26 }
 0x1b0   : > { %v825_v6 = vpop.permute.xlu1 %824  ;;  %v790_v8 = vpop.permute.xlu0 %789 }
 0x1b1   : > { %v866_v9 = vsub.f32 %v2123_v3, %v825_v6  ;;  %v859_v58 = vsub.f32 %v2127_v4, %v790_v8  ;;  %1866 = vpow2.f32 %v875_v60 }
 0x1b2   : > { %1868 = vpow2.f32 %v889_v27 }
 0x1b3   : > { %v891_v32 = vmul.f32 1.442695, %v866_v9  ;;  %v877_v44 = vmul.f32 1.442695, %v859_v58 }
 0x1b4   : > { %v795_v37 = vpop.permute.xlu1 %794  ;;  %v830_v7 = vpop.permute.xlu0 %829 }
 0x1b5   : > { %1870 = vpow2.f32 %v891_v32  ;;  %v860_v57 = vsub.f32 %v2146_v18, %v795_v37  ;;  %v867_v52 = vsub.f32 %v2150_v20, %v830_v7 }
 0x1b6   : > { %1872 = vpow2.f32 %v877_v44 }
 0x1b7   : > { %v1865_v53 = vpop.eup %1864  ;;  %v879_v33 = vmul.f32 1.442695, %v860_v57  ;;  %v893_v45 = vmul.f32 1.442695, %v867_v52 }
 0x1b8   : > { %937 = vadd.xlane.f32.xlu0 %v1865_v53  ;;  %v835_v26 = vpop.permute.xlu1 %834  ;;  %v800_v3 = vpop.permute.xlu0 %799 }
 0x1b9   : > { %1874 = vpow2.f32 %v879_v33  ;;  %v868_v4 = vsub.f32 %v2169_v34, %v835_v26  ;;  %v861_v9 = vsub.f32 %v2173_v35, %v800_v3 }
 0x1ba   : > { %1876 = vpow2.f32 %v893_v45 }
 0x1bb   : > { %v895_v58 = vmul.f32 1.442695, %v868_v4  ;;  %v881_v6 = vmul.f32 1.442695, %v861_v9  ;;  %v1867_v27 = vpop.eup %1866 }
 0x1bc   : > { %v805_v32 = vpop.permute.xlu1 %804  ;;  %v840_v18 = vpop.permute.xlu0 %839  ;;  %939 = vadd.xlane.f32.xlu1 %v1867_v27  ;;  %v1114_v60 = vpack.c.bf16 %v1867_v27, %v1865_v53 }
 0x1bd   : > { %1878 = vpow2.f32 %v895_v58  ;;  %v862_v20 = vsub.f32 %v2192_v50, %v805_v32  ;;  %v869_v44 = vsub.f32 %v2196_v51, %v840_v18  ;;  %v1869_v61 = vpop.eup %1868 }
 0x1be   : > { %1880 = vpow2.f32 %v881_v6  ;;  %1795 = vmatprep.mubr.bf16.mxu0 %v1114_v60 }
 0x1bf   : > { %v1871_v8 = vpop.eup %1870  ;;  %v883_v19 = vmul.f32 1.442695, %v862_v20  ;;  %v897_v35 = vmul.f32 1.442695, %v869_v44 }
 0x1c0   : > { %v1873_v34 = vpop.eup %1872  ;;  %v845_v37 = vpop.permute.xlu1 %844  ;;  %v1118_v57 = vpack.c.bf16 %v1871_v8, %v1869_v61 }
 0x1c1   : > { %v810_v7 = vpop.permute.xlu0 %809  ;;  %1882 = vpow2.f32 %v883_v19  ;;  %v870_v52 = vsub.f32 %v2212_v2, %v845_v37  ;;  %941 = vadd.xlane.f32.xlu0 %v1873_v34 }
 0x1c2   : > { %v863_v50 = vsub.f32 %v2216_v5, %v810_v7  ;;  %1803 = vmatprep.mubr.bf16.mxu1 %v1118_v57  ;;  %1884 = vpow2.f32 %v897_v35 }
 0x1c3   : > { %v1875_v33 = vpop.eup %1874  ;;  %v899_v51 = vmul.f32 1.442695, %v870_v52 }
 0x1c4   : > { %v885_v53 = vmul.f32 1.442695, %v863_v50  ;;  %v815_v45 = vpop.permute.xlu1 %814  ;;  %v1115_v3 = vpack.c.bf16 %v1875_v33, %v1873_v34  ;;  %v1877_v58 = vpop.eup %1876  ;;  %v745_v50 = vmul.f32 1.442695, %v729_v24 }
 0x1c5   : > { %v850_v26 = vpop.permute.xlu0 %849  ;;  %1886 = vpow2.f32 %v899_v51  ;;  %v864_v4 = vsub.f32 %v2259_v11, %v815_v45  ;;  %943 = vadd.xlane.f32.xlu0 %v1875_v33 }
 0x1c6   : > { %v871_v9 = vsub.f32 %v2263_v12, %v850_v26  ;;  %1888 = vpow2.f32 %v885_v53  ;;  %1796 = vmatmul.mubr.bf16.vlgmr.msra.gmra.mrb[0].mxu0 %v1115_v3  ;;  %v2727_v53 = vsub.f32 %v2321_v43, %v2338_v54  ;;  %v2728_v26 = vmov 0.0  }
 0x1c7   : > { %v1879_v2 = vpop.eup %1878  ;;  %v887_v6 = vmul.f32 1.442695, %v864_v4  ;;  %418 = vst.msk [vmem:[#allocation4] sm:$0xff] %vm417_vm3, %v2728_v26  ;;  %419 = vst.msk [vmem:[#allocation4 + $0x8] sm:$0xff] %vm417_vm3, %v2728_v26  ;;  %v2732_v43 = vsub.f32 %v2405_v59, %v2422_v38  ;;  %v2735_v4 = vsub.f32 %v2319_v42, %v2335_v49  ;;  %v2738_v42 = vsub.f32 %v2384_v25, %v2401_v47 }
 0x1c8   : > { %v1881_v5 = vpop.eup %1880  ;;  %v901_v27 = vmul.f32 1.442695, %v871_v9  ;;  %v855_v32 = vpop.permute.xlu1 %854  ;;  %v1119_v18 = vpack.c.bf16 %v1879_v2, %v1877_v58  ;;  %v751_v45 = vmul.f32 1.442695, %v2727_v53  ;;  %420 = vst.msk [vmem:[#allocation4 + $0x10] sm:$0xff] %vm417_vm3, %v2728_v26  ;;  %421 = vst.msk [vmem:[#allocation4 + $0x18] sm:$0xff] %vm417_vm3, %v2728_v26 }
 0x1c9   : > { %1890 = vpow2.f32 %v887_v6  ;;  %v872_v20 = vsub.f32 %v2267_v14, %v855_v32  ;;  %945 = vadd.xlane.f32.xlu1 %v1881_v5  ;;  %422 = vst.msk [vmem:[#allocation4 + $0x20] sm:$0xff] %vm417_vm3, %v2728_v26  ;;  %423 = vst.msk [vmem:[#allocation4 + $0x28] sm:$0xff] %vm417_vm3, %v2728_v26  ;;  %v759_v54 = vmul.f32 1.442695, %v2732_v43  ;;  %v765_v59 = vmul.f32 1.442695, %v2735_v4 }
 0x1ca   : > { %1804 = vmatmul.mubr.bf16.vlgmr.msra.gmra.mrb[0].mxu1 %v1119_v18  ;;  %1892 = vpow2.f32 %v901_v27  ;;  %424 = vst.msk [vmem:[#allocation4 + $0x30] sm:$0xff] %vm417_vm3, %v2728_v26  ;;  %425 = vst.msk [vmem:[#allocation4 + $0x38] sm:$0xff] %vm417_vm3, %v2728_v26  ;;  %v771_v49 = vmul.f32 1.442695, %v2738_v42  ;;  %v905_v27 = vld [vmem:[#allocation3] sm:$0xff]  ;;  %v910_v53 = vld [vmem:[#allocation3 + $0x28] sm:$0xff] }
 0x1cb   : > { %v1883_v44 = vpop.eup %1882  ;;  %v903_v60 = vmul.f32 1.442695, %v872_v20  ;;  %426 = vst.msk [vmem:[#allocation4 + $0x40] sm:$0xff] %vm417_vm3, %v2728_v26  ;;  %427 = vst.msk [vmem:[#allocation4 + $0x48] sm:$0xff] %vm417_vm3, %v2728_v26  ;;  %v915_v42 = vld [vmem:[#allocation3 + $0x50] sm:$0xff] }
 0x1cc   : > { %947 = vadd.xlane.f32.xlu0 %v1883_v44  ;;  %v1116_v11 = vpack.c.bf16 %v1883_v44, %v1881_v5  ;;  %v1885_v12 = vpop.eup %1884  ;;  %428 = vst.msk [vmem:[#allocation4 + $0x50] sm:$0xff] %vm417_vm3, %v2728_v26  ;;  %429 = vst.msk [vmem:[#allocation4 + $0x58] sm:$0xff] %vm417_vm3, %v2728_v26  ;;  %v906_v44 = vld [vmem:[#allocation3 + $0x8] sm:$0xff] }
 0x1cd   : > { %1894 = vpow2.f32 %v903_v60  ;;  %430 = vst.msk [vmem:[#allocation4 + $0x60] sm:$0xff] %vm417_vm3, %v2728_v26  ;;  %431 = vst.msk [vmem:[#allocation4 + $0x68] sm:$0xff] %vm417_vm3, %v2728_v26 }
 0x1ce   : > { %1799 = vmatprep.mubr.bf16.mxu0 %v1116_v11  ;;  %1896 = vpow2.f32 %v745_v50  ;;  %432 = vst.msk [vmem:[#allocation4 + $0x70] sm:$0xff] %vm417_vm3, %v2728_v26  ;;  %433 = vst.msk [vmem:[#allocation4 + $0x78] sm:$0xff] %vm417_vm3, %v2728_v26 }
 0x1cf   : > { %v1887_v19 = vpop.eup %1886 }
 0x1d0   : > { %v1889_v34 = vpop.eup %1888  ;;  %v1120_v35 = vpack.c.bf16 %v1887_v19, %v1885_v12 }
 0x1d1   : > { %949 = vadd.xlane.f32.xlu1 %v1889_v34 }
 0x1d2   : > { %1807 = vmatprep.mubr.bf16.mxu1 %v1120_v35 }
 0x1d3   : > { %v1891_v37 = vpop.eup %1890 }
 0x1d4   : > { %951 = vadd.xlane.f32.xlu0 %v1891_v37  ;;  %v1117_v7 = vpack.c.bf16 %v1891_v37, %v1889_v34  ;;  %v1893_v14 = vpop.eup %1892  ;;  %v908_v37 = vld [vmem:[#allocation3 + $0x18] sm:$0xff] }
 0x1d5   : > { %953 = vadd.xlane.f32.xlu1 %v1869_v61  ;;  %v2725_v61 = vsub.f32 %v2298_v30, %v2314_v40  ;;  %v2731_v30 = vsub.f32 %v2382_v17, %v2398_v46 }
 0x1d6   : > { %1800 = vmatmul.mubr.bf16.gmra.mrb[4].mxu0 %v1117_v7 }
 0x1d7   : > { %v1895_v57 = vpop.eup %1894  ;;  %v749_v33 = vmul.f32 1.442695, %v2725_v61  ;;  %v757_v40 = vmul.f32 1.442695, %v2731_v30  ;;  %v909_v61 = vld [vmem:[#allocation3 + $0x20] sm:$0xff] }
 0x1d8   : > { %955 = vadd.xlane.f32.xlu0 %v1871_v8  ;;  %v1121_v52 = vpack.c.bf16 %v1895_v57, %v1893_v14  ;;  %v2726_v8 = vsub.f32 %v2282_v22, %v2293_v28  ;;  %v2730_v22 = vsub.f32 %v2363_v1, %v2380_v15  ;;  %v1897_v28 = vpop.eup %1896  ;;  %v2734_v1 = vsub.f32 %v2300_v31, %v2317_v41 }
 0x1d9   : > { %957 = vadd.xlane.f32.xlu1 %v1877_v58  ;;  %1898 = vpow2.f32 %v749_v33  ;;  %v2737_v31 = vsub.f32 %v2361_v0, %v2377_v13  ;;  %v2740_v0 = vsub.f32 %v2424_v39, %v2437_v10  ;;  %v921_v32 = vmul.f32 %v1897_v28, %v905_v27 }
 0x1da   : > { %1808 = vmatmul.mubr.bf16.gmra.mrb[4].mxu1 %v1121_v52  ;;  %v747_v51 = vmul.f32 1.442695, %v2726_v8  ;;  %v755_v24 = vmul.f32 1.442695, %v2730_v22  ;;  %v763_v15 = vmul.f32 1.442695, %v2734_v1 }
 0x1db   : > { %v769_v41 = vmul.f32 1.442695, %v2737_v31  ;;  %v775_v13 = vmul.f32 1.442695, %v2740_v0 }
 0x1dc   : > { %959 = vadd.xlane.f32.xlu0 %v1879_v2  ;;  %1900 = vpow2.f32 %v747_v51  ;;  %v773_v2 = vmul.f32 1.442695, %v2739_v63 }
 0x1dd   : > { %961 = vadd.xlane.f32.xlu1 %v1885_v12  ;;  %1902 = vpow2.f32 %v751_v45  ;;  %v907_v12 = vld [vmem:[#allocation3 + $0x10] sm:$0xff] }
 0x1de   : > { %1904 = vpow2.f32 %v753_v21 }
 0x1df   : > { %1906 = vpow2.f32 %v755_v24 }
 0x1e0   : > { %963 = vadd.xlane.f32.xlu0 %v1887_v19  ;;  %1908 = vpow2.f32 %v757_v40  ;;  %v911_v40 = vld [vmem:[#allocation3 + $0x30] sm:$0xff] }
 0x1e1   : > { %965 = vadd.xlane.f32.xlu1 %v1893_v14  ;;  %1910 = vpow2.f32 %v759_v54 }
 0x1e2   : > { %1912 = vpow2.f32 %v761_v62 }
 0x1e3   : > { %v1899_v3 = vpop.eup %1898  ;;  %1914 = vpow2.f32 %v763_v15  ;;  %v913_v15 = vld [vmem:[#allocation3 + $0x40] sm:$0xff] }
 0x1e4   : > { %967 = vadd.xlane.f32.xlu0 %v1895_v57  ;;  %1916 = vpow2.f32 %v765_v59  ;;  %v923_v34 = vmul.f32 %v1899_v3, %v907_v12 }
 0x1e5   : > { %1918 = vpow2.f32 %v767_v29 }
 0x1e6   : > { %v1901_v17 = vpop.eup %1900  ;;  %1920 = vpow2.f32 %v769_v41 }
 0x1e7   : > { %v1903_v46 = vpop.eup %1902  ;;  %1922 = vpow2.f32 %v771_v49  ;;  %v922_v60 = vmul.f32 %v1901_v17, %v906_v44 }
 0x1e8   : > { %v1905_v38 = vpop.eup %1904  ;;  %1924 = vpow2.f32 %v773_v2  ;;  %v924_v52 = vmul.f32 %v1903_v46, %v908_v37  ;;  %v919_v37 = vld [vmem:[#allocation3 + $0x70] sm:$0xff] }
 0x1e9   : > { %v2528_v9 = vpop.eup %1906  ;;  %1926 = vpow2.f32 %v775_v13  ;;  %v925_v51 = vmul.f32 %v1905_v38, %v909_v61 }
 0x1ea   : > { %v2537_v58 = vpop.eup %1908  ;;  %v926_v21 = vmul.f32 %v2528_v9, %v910_v53 }
 0x1eb   : > { %v2539_v56 = vpop.eup %1910 }
 0x1ec   : > { %v2549_v25 = vpop.eup %1912 }
 0x1ed   : > { %v2551_v47 = vpop.eup %1914  ;;  %v929_v23 = vmul.f32 %v2549_v25, %v913_v15 }
 0x1ee   : > { %v2555_v48 = vpop.eup %1916 }
 0x1ef   : > { %v2557_v36 = vpop.eup %1918  ;;  %v931_v0 = vmul.f32 %v2555_v48, %v915_v42 }
 0x1f0   : > { %v2561_v39 = vpop.eup %1920 }
 0x1f1   : > { %v2563_v10 = vpop.eup %1922 }
 0x1f2   : > { %1020 = vperm.xlu1 %1855, %v1897_v28   ;;  %v2567_v6 = vpop.eup %1924 }
 0x1f3   : > { %v2569_v5 = vpop.eup %1926 }
 0x1f6   : > { %1030 = vperm.xlu1 %1855, %v1899_v3   ;;  %v927_v3 = vmul.f32 %v2537_v58, %v911_v40 }
 0x1fa   : > { %1035 = vperm.xlu1 %1855, %v1903_v46   ;;  %1025 = vperm.xlu0 %1854, %v1901_v17   ;;  %v928_v46 = vmul.f32 %v2539_v56, %v912_v55 }
 0x1fe   : > { %1045 = vperm.xlu1 %1855, %v2528_v9   ;;  %1040 = vperm.xlu0 %1854, %v1905_v38   ;;  %v914_v38 = vld [vmem:[#allocation3 + $0x48] sm:$0xff] }
 0x202   : > { %1055 = vperm.xlu1 %1855, %v2539_v56   ;;  %1050 = vperm.xlu0 %1854, %v2537_v58   ;;  %v930_v56 = vmul.f32 %v2551_v47, %v914_v38 }
 0x206   : > { %1065 = vperm.xlu1 %1855, %v2551_v47   ;;  %1060 = vperm.xlu0 %1854, %v2549_v25   ;;  %v916_v25 = vld [vmem:[#allocation3 + $0x58] sm:$0xff] }
 0x207   : > { %v932_v44 = vmul.f32 %v2557_v36, %v916_v25 }
 0x20a   : > { %1075 = vperm.xlu1 %1855, %v2557_v36   ;;  %1070 = vperm.xlu0 %1854, %v2555_v48   ;;  %v918_v48 = vld [vmem:[#allocation3 + $0x68] sm:$0xff] }
 0x20b   : > { %v934_v36 = vmul.f32 %v2563_v10, %v918_v48 }
 0x20e   : > { %1085 = vperm.xlu1 %1855, %v2563_v10   ;;  %1080 = vperm.xlu0 %1854, %v2561_v39  }
 0x212   : > { %1095 = vperm.xlu1 %1855, %v2569_v5   ;;  %1090 = vperm.xlu0 %1854, %v2567_v6  }
 0x245   : > { %v938_v18 = vpop.xlane.xlu0 %937 }
 0x246   : > { %v969_v20 = vadd.f32 %v938_v18, %v921_v32  ;;  %v917_v18 = vld [vmem:[#allocation3 + $0x60] sm:$0xff] }
 0x248   : > { %986 = vst.msk [vmem:[#allocation3] sm:$0xff] %vm384_vm0, %v969_v20 }
 0x249   : > { %v940_v11 = vpop.xlane.xlu1 %939 }
 0x24a   : > { %v970_v19 = vadd.f32 %v940_v11, %v922_v60  ;;  %v933_v11 = vmul.f32 %v2561_v39, %v917_v18  ;;  %v935_v39 = vmul.f32 %v2567_v6, %v919_v37  ;;  %v1002_v18 = vld [vmem:[#allocation4] sm:$0xff] }
 0x24c   : > { %987 = vst.msk [vmem:[#allocation3 + $0x8] sm:$0xff] %vm384_vm0, %v970_v19 }
 0x24e   : > { %v942_v35 = vpop.xlane.xlu0 %941 }
 0x24f   : > { %v971_v7 = vadd.f32 %v942_v35, %v923_v34  ;;  %v1335_v14 = vld [vmem:[#allocation3] sm:$0xff] }
 0x250   : > { %v1351_v57 = vmax.f32 %v1335_v14, 1e-12 }
 0x251   : > { %988 = vst.msk [vmem:[#allocation3 + $0x10] sm:$0xff] %vm384_vm0, %v971_v7 }
 0x252   : > { %v944_v50 = vpop.xlane.xlu0 %943  ;;  %1928 = vrcp.f32 %v1351_v57 }
 0x253   : > { %v972_v33 = vadd.f32 %v944_v50, %v924_v52  ;;  %v1336_v8 = vld [vmem:[#allocation3 + $0x8] sm:$0xff] }
 0x254   : > { %v1352_v45 = vmax.f32 %v1336_v8, 1e-12 }
 0x255   : > { %989 = vst.msk [vmem:[#allocation3 + $0x18] sm:$0xff] %vm384_vm0, %v972_v33  ;;  %v920_v33 = vld [vmem:[#allocation3 + $0x78] sm:$0xff] }
 0x256   : > { %v946_v26 = vpop.xlane.xlu1 %945  ;;  %1930 = vrcp.f32 %v1352_v45  ;;  %v936_v10 = vmul.f32 %v2569_v5, %v920_v33 }
 0x257   : > { %v973_v16 = vadd.f32 %v946_v26, %v925_v51 }
 0x258   : > { %v1337_v22 = vld [vmem:[#allocation3 + $0x10] sm:$0xff] }
 0x259   : > { %990 = vst.msk [vmem:[#allocation3 + $0x20] sm:$0xff] %vm384_vm0, %v973_v16  ;;  %v948_v24 = vpop.xlane.xlu0 %947  ;;  %v1353_v28 = vmax.f32 %v1337_v22, 1e-12 }
 0x25a   : > { %v974_v30 = vadd.f32 %v948_v24, %v926_v21 }
 0x25b   : > { %1932 = vrcp.f32 %v1353_v28 }
 0x25c   : > { %v1929_v43 = vpop.eup %1928  ;;  %991 = vst.msk [vmem:[#allocation3 + $0x28] sm:$0xff] %vm384_vm0, %v974_v30  ;;  %v1338_v54 = vld [vmem:[#allocation3 + $0x18] sm:$0xff] }
 0x25d   : > { %1401 = vperm.xlu0 %1854, %v1929_v43   ;;  %v1354_v62 = vmax.f32 %v1338_v54, 1e-12 }
 0x25e   : > { %v950_v1 = vpop.xlane.xlu1 %949 }
 0x25f   : > { %v975_v17 = vadd.f32 %v950_v1, %v927_v3  ;;  %1934 = vrcp.f32 %v1354_v62 }
 0x260   : > { %v1339_v4 = vld [vmem:[#allocation3 + $0x20] sm:$0xff]  ;;  %v1931_v59 = vpop.eup %1930 }
 0x261   : > { %992 = vst.msk [vmem:[#allocation3 + $0x30] sm:$0xff] %vm384_vm0, %v975_v17  ;;  %v952_v29 = vpop.xlane.xlu0 %951  ;;  %v1355_v9 = vmax.f32 %v1339_v4, 1e-12  ;;  %1406 = vperm.xlu1 %1855, %v1931_v59  }
 0x262   : > { %v954_v31 = vpop.xlane.xlu1 %953  ;;  %v976_v41 = vadd.f32 %v952_v29, %v928_v46 }
 0x263   : > { %v977_v49 = vadd.f32 %v954_v31, %v929_v23  ;;  %1936 = vrcp.f32 %v1355_v9  ;;  %v1340_v58 = vld [vmem:[#allocation3 + $0x28] sm:$0xff] }
 0x264   : > { %993 = vst.msk [vmem:[#allocation3 + $0x38] sm:$0xff] %vm384_vm0, %v976_v41  ;;  %v1356_v63 = vmax.f32 %v1340_v58, 1e-12 }
 0x265   : > { %v1933_v2 = vpop.eup %1932  ;;  %994 = vst.msk [vmem:[#allocation3 + $0x40] sm:$0xff] %vm384_vm0, %v977_v49  ;;  %v956_v13 = vpop.xlane.xlu0 %955 }
 0x266   : > { %v958_v27 = vpop.xlane.xlu1 %957  ;;  %1411 = vperm.xlu0 %1854, %v1933_v2   ;;  %v978_v32 = vadd.f32 %v956_v13, %v930_v56  ;;  %1938 = vrcp.f32 %v1356_v63 }
 0x267   : > { %v979_v20 = vadd.f32 %v958_v27, %v931_v0  ;;  %v1004_v27 = vld [vmem:[#allocation4 + $0x10] sm:$0xff] }
 0x268   : > { %995 = vst.msk [vmem:[#allocation3 + $0x48] sm:$0xff] %vm384_vm0, %v978_v32  ;;  %v1341_v60 = vld [vmem:[#allocation3 + $0x30] sm:$0xff] }
 0x269   : > { %v1935_v47 = vpop.eup %1934  ;;  %996 = vst.msk [vmem:[#allocation3 + $0x50] sm:$0xff] %vm384_vm0, %v979_v20  ;;  %v960_v12 = vpop.xlane.xlu0 %959  ;;  %v1357_v19 = vmax.f32 %v1341_v60, 1e-12  ;;  %v1005_v20 = vld [vmem:[#allocation4 + $0x18] sm:$0xff]  ;;  %v1003_v60 = vld [vmem:[#allocation4 + $0x8] sm:$0xff] }
 0x26a   : > { %v962_v34 = vpop.xlane.xlu1 %961  ;;  %1416 = vperm.xlu1 %1855, %v1935_v47   ;;  %v980_v35 = vadd.f32 %v960_v12, %v932_v44 }
 0x26b   : > { %v981_v7 = vadd.f32 %v962_v34, %v933_v11  ;;  %1940 = vrcp.f32 %v1357_v19  ;;  %v1342_v14 = vld [vmem:[#allocation3 + $0x38] sm:$0xff]  ;;  %v1012_v11 = vld [vmem:[#allocation4 + $0x50] sm:$0xff]  ;;  %v1010_v34 = vld [vmem:[#allocation4 + $0x40] sm:$0xff] }
 0x26c   : > { %997 = vst.msk [vmem:[#allocation3 + $0x58] sm:$0xff] %vm384_vm0, %v980_v35  ;;  %v1343_v57 = vld [vmem:[#allocation3 + $0x40] sm:$0xff]  ;;  %v1358_v52 = vmax.f32 %v1342_v14, 1e-12  ;;  %v1013_v14 = vld [vmem:[#allocation4 + $0x58] sm:$0xff] }
 0x26d   : > { %v1937_v50 = vpop.eup %1936  ;;  %998 = vst.msk [vmem:[#allocation3 + $0x60] sm:$0xff] %vm384_vm0, %v981_v7  ;;  %v964_v61 = vpop.xlane.xlu0 %963  ;;  %v1359_v8 = vmax.f32 %v1343_v57, 1e-12 }
 0x26e   : > { %v966_v51 = vpop.xlane.xlu1 %965  ;;  %1421 = vperm.xlu0 %1854, %v1937_v50   ;;  %v982_v53 = vadd.f32 %v964_v61, %v934_v36  ;;  %1942 = vrcp.f32 %v1358_v52  ;;  %v1011_v50 = vld [vmem:[#allocation4 + $0x48] sm:$0xff] }
 0x26f   : > { %v983_v45 = vadd.f32 %v966_v51, %v935_v39  ;;  %1944 = vrcp.f32 %v1359_v8  ;;  %v1344_v26 = vld [vmem:[#allocation3 + $0x48] sm:$0xff] }
 0x270   : > { %v1939_v16 = vpop.eup %1938  ;;  %999 = vst.msk [vmem:[#allocation3 + $0x68] sm:$0xff] %vm384_vm0, %v982_v53  ;;  %v1345_v21 = vld [vmem:[#allocation3 + $0x50] sm:$0xff]  ;;  %v1360_v22 = vmax.f32 %v1344_v26, 1e-12 }
 0x271   : > { %1000 = vst.msk [vmem:[#allocation3 + $0x70] sm:$0xff] %vm384_vm0, %v983_v45  ;;  %1426 = vperm.xlu1 %1855, %v1939_v16   ;;  %v968_v6 = vpop.xlane.xlu0 %967  ;;  %v1361_v24 = vmax.f32 %v1345_v21, 1e-12 }
 0x272   : > { %v984_v28 = vadd.f32 %v968_v6, %v936_v10  ;;  %1946 = vrcp.f32 %v1360_v22  ;;  %v1021_v5 = vpop.permute.xlu1 %1020 }
 0x273   : > { %1948 = vrcp.f32 %v1361_v24  ;;  %v1346_v30 = vld [vmem:[#allocation3 + $0x58] sm:$0xff]  ;;  %v1098_v47 = vmul.f32 %v1021_v5, %v1002_v18  ;;  %v1007_v5 = vld [vmem:[#allocation4 + $0x28] sm:$0xff] }
 0x274   : > { %1001 = vst.msk [vmem:[#allocation3 + $0x78] sm:$0xff] %vm384_vm0, %v984_v28  ;;  %v1347_v40 = vld [vmem:[#allocation3 + $0x60] sm:$0xff]  ;;  %v1362_v43 = vmax.f32 %v1346_v30, 1e-12 }
 0x275   : > { %v1941_v54 = vpop.eup %1940  ;;  %v1363_v3 = vmax.f32 %v1347_v40, 1e-12  ;;  %v1008_v40 = vld [vmem:[#allocation4 + $0x30] sm:$0xff] }
 0x276   : > { %1431 = vperm.xlu0 %1854, %v1941_v54   ;;  %1950 = vrcp.f32 %v1362_v43  ;;  %v1031_v38 = vpop.permute.xlu1 %1030  ;;  %v1006_v54 = vld [vmem:[#allocation4 + $0x20] sm:$0xff] }
 0x277   : > { %1952 = vrcp.f32 %v1363_v3  ;;  %v1348_v55 = vld [vmem:[#allocation3 + $0x68] sm:$0xff]  ;;  %v1100_v44 = vmul.f32 %v1031_v38, %v1004_v27  ;;  %v1009_v3 = vld [vmem:[#allocation4 + $0x38] sm:$0xff] }
 0x278   : > { %v1943_v62 = vpop.eup %1942  ;;  %v1349_v1 = vld [vmem:[#allocation3 + $0x70] sm:$0xff]  ;;  %v1364_v15 = vmax.f32 %v1348_v55, 1e-12  ;;  %v1017_v38 = vld [vmem:[#allocation4 + $0x78] sm:$0xff] }
 0x279   : > { %v1945_v17 = vpop.eup %1944  ;;  %1436 = vperm.xlu1 %1855, %v1943_v62   ;;  %v1365_v46 = vmax.f32 %v1349_v1, 1e-12  ;;  %v1026_v41 = vpop.permute.xlu0 %1025  ;;  %v1016_v1 = vld [vmem:[#allocation4 + $0x70] sm:$0xff] }
 0x27a   : > { %1441 = vperm.xlu0 %1854, %v1945_v17   ;;  %1954 = vrcp.f32 %v1364_v15  ;;  %v1036_v42 = vpop.permute.xlu1 %1035  ;;  %v1099_v7 = vmul.f32 %v1026_v41, %v1003_v60 }
 0x27b   : > { %1956 = vrcp.f32 %v1365_v46  ;;  %v1350_v4 = vld [vmem:[#allocation3 + $0x78] sm:$0xff]  ;;  %v1101_v19 = vmul.f32 %v1036_v42, %v1005_v20  ;;  %v1015_v42 = vld [vmem:[#allocation4 + $0x68] sm:$0xff] }
 0x27c   : > { %v1947_v59 = vpop.eup %1946  ;;  %v1366_v23 = vmax.f32 %v1350_v4, 1e-12  ;;  %v1014_v4 = vld [vmem:[#allocation4 + $0x60] sm:$0xff] }
 0x27d   : > { %v1949_v29 = vpop.eup %1948  ;;  %1446 = vperm.xlu1 %1855, %v1947_v59   ;;  %v1041_v56 = vpop.permute.xlu0 %1040 }
 0x27e   : > { %1451 = vperm.xlu0 %1854, %v1949_v29   ;;  %1958 = vrcp.f32 %v1366_v23  ;;  %v2600_v2 = vpop.permute.xlu1 %1045  ;;  %v1102_v62 = vmul.f32 %v1041_v56, %v1006_v54 }
 0x27f   : > { %v1103_v29 = vmul.f32 %v2600_v2, %v1007_v5 }
 0x280   : > { %v1951_v9 = vpop.eup %1950 }
 0x281   : > { %v1953_v31 = vpop.eup %1952  ;;  %1456 = vperm.xlu1 %1855, %v1951_v9   ;;  %v1051_v0 = vpop.permute.xlu0 %1050 }
 0x282   : > { %1461 = vperm.xlu0 %1854, %v1953_v31   ;;  %v1056_v13 = vpop.permute.xlu1 %1055  ;;  %v1104_v55 = vmul.f32 %v1051_v0, %v1008_v40 }
 0x283   : > { %v1105_v46 = vmul.f32 %v1056_v13, %v1009_v3 }
 0x284   : > { %v1955_v49 = vpop.eup %1954 }
 0x285   : > { %v1957_v58 = vpop.eup %1956  ;;  %1466 = vperm.xlu1 %1855, %v1955_v49   ;;  %v1061_v25 = vpop.permute.xlu0 %1060 }
 0x286   : > { %1471 = vperm.xlu0 %1854, %v1957_v58   ;;  %v1066_v32 = vpop.permute.xlu1 %1065  ;;  %v1106_v8 = vmul.f32 %v1061_v25, %v1010_v34 }
 0x287   : > { %v1107_v10 = vmul.f32 %v1066_v32, %v1011_v50 }
 0x288   : > { %v1959_v63 = vpop.eup %1958 }
 0x289   : > { %1476 = vperm.xlu1 %1855, %v1959_v63   ;;  %v1071_v12 = vpop.permute.xlu0 %1070 }
 0x28a   : > { %v1076_v36 = vpop.permute.xlu1 %1075  ;;  %v1108_v39 = vmul.f32 %v1071_v12, %v1012_v11  ;;  %v2623_v12 = vld [vmem:[%s368_s6] ss:$0 sm:$0xff] }
 0x28b   : > { %v1109_v45 = vmul.f32 %v1076_v36, %v1013_v14 }
 0x28d   : > { %v1081_v30 = vpop.permute.xlu0 %1080 }
 0x28e   : > { %v1086_v43 = vpop.permute.xlu1 %1085  ;;  %v1110_v56 = vmul.f32 %v1081_v30, %v1014_v4 }
 0x28f   : > { %v1111_v32 = vmul.f32 %v1086_v43, %v1015_v42 }
 0x291   : > { %v1091_v15 = vpop.permute.xlu0 %1090 }
 0x292   : > { %v1096_v9 = vpop.permute.xlu1 %1095  ;;  %v1112_v49 = vmul.f32 %v1091_v15, %v1016_v1 }
 0x293   : > { %v1113_v25 = vmul.f32 %v1096_v9, %v1017_v38 }
 0x299   : > { %v1797_v48 = vpop.f32.mrb[0].mxu0 }
 0x29a   : > { %v1285_v35 = vadd.f32 %v1797_v48, %v1100_v44  ;;  %v1220_v37 = vpop.f32.mrb[1].mxu0 }
 0x29b   : > { %v1283_v57 = vadd.f32 %v1220_v37, %v1098_v47  ;;  %v1798_v52 = vpop.f32.mrb[2].mxu0 }
 0x29c   : > { %1302 = vst.msk [vmem:[#allocation4 + $0x10] sm:$0xff] %vm417_vm3, %v1285_v35  ;;  %v1286_v61 = vadd.f32 %v1798_v52, %v1101_v19  ;;  %v1223_v33 = vpop.f32.mrb[3].mxu0 }
 0x29d   : > { %1300 = vst.msk [vmem:[#allocation4] sm:$0xff] %vm417_vm3, %v1283_v57  ;;  %v1284_v51 = vadd.f32 %v1223_v33, %v1099_v7  ;;  %v1805_v53 = vpop.f32.mrb[0].mxu1 }
 0x29e   : > { %1303 = vst.msk [vmem:[#allocation4 + $0x18] sm:$0xff] %vm417_vm3, %v1286_v61  ;;  %v1293_v26 = vadd.f32 %v1805_v53, %v1108_v39  ;;  %v1252_v16 = vpop.f32.mrb[1].mxu1 }
 0x29f   : > { %1301 = vst.msk [vmem:[#allocation4 + $0x8] sm:$0xff] %vm417_vm3, %v1284_v51  ;;  %v1291_v21 = vadd.f32 %v1252_v16, %v1106_v8  ;;  %v1806_v22 = vpop.f32.mrb[2].mxu1 }
 0x2a0   : > { %1310 = vst.msk [vmem:[#allocation4 + $0x50] sm:$0xff] %vm417_vm3, %v1293_v26  ;;  %v1294_v6 = vadd.f32 %v1806_v22, %v1109_v45  ;;  %v1255_v24 = vpop.f32.mrb[3].mxu1 }
 0x2a1   : > { %1308 = vst.msk [vmem:[#allocation4 + $0x40] sm:$0xff] %vm417_vm3, %v1291_v21  ;;  %v1292_v28 = vadd.f32 %v1255_v24, %v1107_v10 }
 0x2a2   : > { %1311 = vst.msk [vmem:[#allocation4 + $0x58] sm:$0xff] %vm417_vm3, %v1294_v6 }
 0x2a3   : > { %1309 = vst.msk [vmem:[#allocation4 + $0x48] sm:$0xff] %vm417_vm3, %v1292_v28  ;;  %v1385_v57 = vld [vmem:[#allocation4 + $0x10] sm:$0xff] }
 0x2a4   : > { %v1383_v11 = vld [vmem:[#allocation4] sm:$0xff] }
 0x2a5   : > { %v1386_v33 = vld [vmem:[#allocation4 + $0x18] sm:$0xff] }
 0x2a6   : > { %v1384_v7 = vld [vmem:[#allocation4 + $0x8] sm:$0xff] }
 0x2a7   : > { %v1393_v42 = vld [vmem:[#allocation4 + $0x50] sm:$0xff] }
 0x2a9   : > { %v1801_v17 = vpop.f32.mrb[4].mxu0 }
 0x2aa   : > { %v1289_v59 = vadd.f32 %v1801_v17, %v1104_v55  ;;  %v1236_v23 = vpop.f32.mrb[5].mxu0  ;;  %v1391_v17 = vld [vmem:[#allocation4 + $0x40] sm:$0xff]  ;;  %v1392_v38 = vld [vmem:[#allocation4 + $0x48] sm:$0xff] }
 0x2ab   : > { %v1287_v31 = vadd.f32 %v1236_v23, %v1102_v62  ;;  %v1802_v41 = vpop.f32.mrb[6].mxu0 }
 0x2ac   : > { %1306 = vst.msk [vmem:[#allocation4 + $0x30] sm:$0xff] %vm417_vm3, %v1289_v59  ;;  %v1290_v58 = vadd.f32 %v1802_v41, %v1105_v46  ;;  %v1239_v63 = vpop.f32.mrb[7].mxu0 }
 0x2ad   : > { %1304 = vst.msk [vmem:[#allocation4 + $0x20] sm:$0xff] %vm417_vm3, %v1287_v31  ;;  %v1288_v0 = vadd.f32 %v1239_v63, %v1103_v29  ;;  %v1809_v13 = vpop.f32.mrb[4].mxu1 }
 0x2ae   : > { %1307 = vst.msk [vmem:[#allocation4 + $0x38] sm:$0xff] %vm417_vm3, %v1290_v58  ;;  %v1297_v2 = vadd.f32 %v1809_v13, %v1112_v49  ;;  %v1268_v27 = vpop.f32.mrb[5].mxu1  ;;  %v1394_v13 = vld [vmem:[#allocation4 + $0x58] sm:$0xff] }
 0x2af   : > { %1305 = vst.msk [vmem:[#allocation4 + $0x28] sm:$0xff] %vm417_vm3, %v1288_v0  ;;  %v1295_v18 = vadd.f32 %v1268_v27, %v1110_v56  ;;  %v1810_v20 = vpop.f32.mrb[6].mxu1 }
 0x2b0   : > { %1314 = vst.msk [vmem:[#allocation4 + $0x70] sm:$0xff] %vm417_vm3, %v1297_v2  ;;  %v1298_v44 = vadd.f32 %v1810_v20, %v1113_v25  ;;  %v1271_v60 = vpop.f32.mrb[7].mxu1 }
 0x2b1   : > { %1312 = vst.msk [vmem:[#allocation4 + $0x60] sm:$0xff] %vm417_vm3, %v1295_v18  ;;  %v1296_v47 = vadd.f32 %v1271_v60, %v1111_v32 }
 0x2b2   : > { %1315 = vst.msk [vmem:[#allocation4 + $0x78] sm:$0xff] %vm417_vm3, %v1298_v44 }
 0x2b3   : > { %1313 = vst.msk [vmem:[#allocation4 + $0x68] sm:$0xff] %vm417_vm3, %v1296_v47  ;;  %v1389_v54 = vld [vmem:[#allocation4 + $0x30] sm:$0xff] }
 0x2b4   : > { %v1387_v26 = vld [vmem:[#allocation4 + $0x20] sm:$0xff] }
 0x2b5   : > { %v1390_v62 = vld [vmem:[#allocation4 + $0x38] sm:$0xff] }
 0x2b6   : > { %v1388_v6 = vld [vmem:[#allocation4 + $0x28] sm:$0xff] }
 0x2b8   : > { %v1395_v32 = vld [vmem:[#allocation4 + $0x60] sm:$0xff] }
 0x2dc   : > { %v1402_v48 = vpop.permute.xlu0 %1401 }
 0x2dd   : > { %v1479_v19 = vmul.f32 %v1402_v48, %v1383_v11  ;;  %v1396_v11 = vld [vmem:[#allocation4 + $0x68] sm:$0xff] }
 0x2df   : > { %v1502_v34 = vadd.f32 %v2623_v12, %v1479_v19 }
 0x2e0   : > { %v1407_v37 = vpop.permute.xlu1 %1406 }
 0x2e1   : > { %v1518_v35 = vmax.f32 %v1502_v34, 0.0  ;;  %v1480_v14 = vmul.f32 %v1407_v37, %v1384_v7 }
 0x2e3   : > { %1534 = vst.msk [vmem:[%s2631_s9] sm:$0xff] %vm417_vm3, %v1518_v35  ;;  %v1503_v36 = vadd.f32 %v2623_v12, %v1480_v14  ;;  %v1397_v35 = vld [vmem:[#allocation4 + $0x70] sm:$0xff] }
 0x2e5   : > { %v1412_v52 = vpop.permute.xlu0 %1411  ;;  %v1519_v50 = vmax.f32 %v1503_v36, 0.0 }
 0x2e6   : > { %v1481_v39 = vmul.f32 %v1412_v52, %v1385_v57  ;;  %v1398_v52 = vld [vmem:[#allocation4 + $0x78] sm:$0xff] }
 0x2e7   : > { %1535 = vst.msk [vmem:[%s2631_s9 + $0x8] sm:$0xff] %vm417_vm3, %v1519_v50 }
 0x2e8   : > { %v1504_v61 = vadd.f32 %v2623_v12, %v1481_v39 }
 0x2e9   : > { %v1417_v8 = vpop.permute.xlu1 %1416 }
 0x2ea   : > { %v1520_v51 = vmax.f32 %v1504_v61, 0.0  ;;  %v1482_v53 = vmul.f32 %v1417_v8, %v1386_v33 }
 0x2ec   : > { %1536 = vst.msk [vmem:[%s2631_s9 + $0x10] sm:$0xff] %vm417_vm3, %v1520_v51  ;;  %v1505_v45 = vadd.f32 %v2623_v12, %v1482_v53 }
 0x2ed   : > { %v1422_v16 = vpop.permute.xlu0 %1421 }
 0x2ee   : > { %v1521_v10 = vmax.f32 %v1505_v45, 0.0  ;;  %v1483_v21 = vmul.f32 %v1422_v16, %v1387_v26 }
 0x2f0   : > { %1537 = vst.msk [vmem:[%s2631_s9 + $0x18] sm:$0xff] %vm417_vm3, %v1521_v10  ;;  %v1506_v22 = vadd.f32 %v2623_v12, %v1483_v21  ;;  %v1427_v24 = vpop.permute.xlu1 %1426 }
 0x2f1   : > { %v1484_v28 = vmul.f32 %v1427_v24, %v1388_v6 }
 0x2f2   : > { %v1522_v30 = vmax.f32 %v1506_v22, 0.0 }
 0x2f3   : > { %v1507_v40 = vadd.f32 %v2623_v12, %v1484_v28 }
 0x2f4   : > { %1538 = vst.msk [vmem:[%s2631_s9 + $0x20] sm:$0xff] %vm417_vm3, %v1522_v30 }
 0x2f5   : > { %v1523_v43 = vmax.f32 %v1507_v40, 0.0  ;;  %v1432_v3 = vpop.permute.xlu0 %1431 }
 0x2f6   : > { %v1485_v5 = vmul.f32 %v1432_v3, %v1389_v54 }
 0x2f7   : > { %1539 = vst.msk [vmem:[%s2631_s9 + $0x28] sm:$0xff] %vm417_vm3, %v1523_v43 }
 0x2f8   : > { %v1508_v55 = vadd.f32 %v2623_v12, %v1485_v5  ;;  %v1437_v1 = vpop.permute.xlu1 %1436 }
 0x2f9   : > { %v1486_v15 = vmul.f32 %v1437_v1, %v1390_v62  ;;  %v1442_v46 = vpop.permute.xlu0 %1441 }
 0x2fa   : > { %v1524_v4 = vmax.f32 %v1508_v55, 0.0  ;;  %v1487_v59 = vmul.f32 %v1442_v46, %v1391_v17 }
 0x2fb   : > { %v1509_v23 = vadd.f32 %v2623_v12, %v1486_v15 }
 0x2fc   : > { %1540 = vst.msk [vmem:[%s2631_s9 + $0x30] sm:$0xff] %vm417_vm3, %v1524_v4  ;;  %v1510_v29 = vadd.f32 %v2623_v12, %v1487_v59  ;;  %v1447_v9 = vpop.permute.xlu1 %1446 }
 0x2fd   : > { %v1525_v31 = vmax.f32 %v1509_v23, 0.0  ;;  %v1488_v41 = vmul.f32 %v1447_v9, %v1392_v38  ;;  %v1452_v49 = vpop.permute.xlu0 %1451 }
 0x2fe   : > { %v1526_v58 = vmax.f32 %v1510_v29, 0.0  ;;  %v1489_v63 = vmul.f32 %v1452_v49, %v1393_v42 }
 0x2ff   : > { %1541 = vst.msk [vmem:[%s2631_s9 + $0x38] sm:$0xff] %vm417_vm3, %v1525_v31  ;;  %v1511_v56 = vadd.f32 %v2623_v12, %v1488_v41 }
 0x300   : > { %1542 = vst.msk [vmem:[%s2631_s9 + $0x40] sm:$0xff] %vm417_vm3, %v1526_v58  ;;  %v1512_v0 = vadd.f32 %v2623_v12, %v1489_v63  ;;  %v1457_v25 = vpop.permute.xlu1 %1456 }
 0x301   : > { %v1527_v2 = vmax.f32 %v1511_v56, 0.0  ;;  %v1490_v27 = vmul.f32 %v1457_v25, %v1394_v13  ;;  %v1462_v18 = vpop.permute.xlu0 %1461 }
 0x302   : > { %v1528_v20 = vmax.f32 %v1512_v0, 0.0  ;;  %v1491_v44 = vmul.f32 %v1462_v18, %v1395_v32 }
 0x303   : > { %1543 = vst.msk [vmem:[%s2631_s9 + $0x48] sm:$0xff] %vm417_vm3, %v1527_v2  ;;  %v1513_v60 = vadd.f32 %v2623_v12, %v1490_v27 }
 0x304   : > { %1544 = vst.msk [vmem:[%s2631_s9 + $0x50] sm:$0xff] %vm417_vm3, %v1528_v20  ;;  %v1514_v47 = vadd.f32 %v2623_v12, %v1491_v44  ;;  %v1467_v48 = vpop.permute.xlu1 %1466 }
 0x305   : > { %v1529_v19 = vmax.f32 %v1513_v60, 0.0  ;;  %v1492_v34 = vmul.f32 %v1467_v48, %v1396_v11  ;;  %v1472_v37 = vpop.permute.xlu0 %1471 }
 0x306   : > { %v1530_v7 = vmax.f32 %v1514_v47, 0.0  ;;  %v1493_v14 = vmul.f32 %v1472_v37, %v1397_v35 }
 0x307   : > { %1545 = vst.msk [vmem:[%s2631_s9 + $0x58] sm:$0xff] %vm417_vm3, %v1529_v19  ;;  %v1515_v36 = vadd.f32 %v2623_v12, %v1492_v34 }
 0x308   : > { %1546 = vst.msk [vmem:[%s2631_s9 + $0x60] sm:$0xff] %vm417_vm3, %v1530_v7  ;;  %v1516_v57 = vadd.f32 %v2623_v12, %v1493_v14  ;;  %v1477_v50 = vpop.permute.xlu1 %1476 }
 0x309   : > { %v1531_v39 = vmax.f32 %v1515_v36, 0.0  ;;  %v1494_v61 = vmul.f32 %v1477_v50, %v1398_v52 }
 0x30a   : > { %v1532_v33 = vmax.f32 %v1516_v57, 0.0 }
 0x30b   : > { %1547 = vst.msk [vmem:[%s2631_s9 + $0x68] sm:$0xff] %vm417_vm3, %v1531_v39  ;;  %v1517_v8 = vadd.f32 %v2623_v12, %v1494_v61 }
 0x30c   : > { %1548 = vst.msk [vmem:[%s2631_s9 + $0x70] sm:$0xff] %vm417_vm3, %v1532_v33 }
 0x30d   : > { %v1533_v51 = vmax.f32 %v1517_v8, 0.0 }
 0x30f   : > { %1549 = vst.msk [vmem:[%s2631_s9 + $0x78] sm:$0xff] %vm417_vm3, %v1533_v51 }
 0x310 PF: > { %s15_s20 = sadd.s32 1, %s1982_s20   ;;  %s2741_s18 = smov %s1978_s19 }
 0x311   : > { %p12_p5 = scmp.ge.s32.totalorder %s15_s20, 6   ;;  %s2742_s19 = smov %s2744_s21 }
 0x313   :  { %14 = sbr.rel (!%p12_p5) target bundleno = 2 (0x2), region = 90 }

// kernel: net_forward.9
= control target key start
LH: loop header
LB: loop body
LE: loop exit
PB: predicated region body
PF: predicated region fallthrough
CT: control target
= control target key end

     0   :  { %v798_v39 = vmov 0.0   ;;  %vm799_vm0 = vmmov 0   ;;  %vm540_vm1 = vcmask 523264   ;;  %vm584_vm2 = vcmask 15360   ;;  %s993_s1 = inlined_call_operand.vmem [shape: bf16[512,128], index: 1, kind: input, shape index: {}]   ;;  %s994_s0 = inlined_call_operand.vmem [shape: bf16[8,512], index: 0, kind: input, shape index: {}]   ;;  %s995_s3 = inlined_call_operand.vmem [shape: bf16[128,64], index: 3, kind: input, shape index: {}]   ;;  %s996_s5 = inlined_call_operand.vmem [shape: bf16[64,2], index: 5, kind: input, shape index: {}]   ;;  %s997_s2 = inlined_call_operand.vmem [shape: f32[1,128], index: 2, kind: input, shape index: {}]   ;;  %s998_s4 = inlined_call_operand.vmem [shape: f32[1,64], index: 4, kind: input, shape index: {}]   ;;  %s999_s6 = inlined_call_operand.vmem [shape: f32[1,2], index: 6, kind: input, shape index: {}]   ;;  %s1000_s7 = inlined_call_operand.vmem [shape: f32[8,2], index: 7, kind: output, shape index: {}]  }
   0x1   :  { %v746_v0 = vld [vmem:[%s993_s1 + $0x40] sm:$0xff]   ;;  %v750_v4 = vld [vmem:[%s993_s1 + $0x48] sm:$0xff]   ;;  %v754_v8 = vld [vmem:[%s993_s1 + $0x50] sm:$0xff]  }
   0x2   :  { %v747_v1 = vld [vmem:[%s993_s1 + $0xc0] sm:$0xff]   ;;  %654 = vmatprep.subr.bf16.mxu0 %v746_v0  ;;  %v751_v5 = vld [vmem:[%s993_s1 + $0xc8] sm:$0xff]   ;;  %v755_v9 = vld [vmem:[%s993_s1 + $0xd0] sm:$0xff]  }
   0x3   :  { %v748_v2 = vld [vmem:[%s993_s1] sm:$0xff]   ;;  %676 = vmatprep.subr.bf16.mxu1 %v747_v1  ;;  %v752_v6 = vld [vmem:[%s993_s1 + $0x8] sm:$0xff]   ;;  %v756_v10 = vld [vmem:[%s993_s1 + $0x10] sm:$0xff]  }
   0x4   :  { %v749_v3 = vld [vmem:[%s993_s1 + $0x80] sm:$0xff]   ;;  %655 = vmatpush3.bf16.msra.mxu0 %v748_v2  ;;  %v753_v7 = vld [vmem:[%s993_s1 + $0x88] sm:$0xff]   ;;  %v757_v11 = vld [vmem:[%s993_s1 + $0x90] sm:$0xff]  }
   0x5   :  { %677 = vmatpush3.bf16.msra.mxu1 %v749_v3  ;;  %656 = vmatprep.subr.bf16.mxu0 %v750_v4  ;;  %v758_v12 = vld [vmem:[%s993_s1 + $0x58] sm:$0xff]   ;;  %v762_v16 = vld [vmem:[%s993_s1 + $0x60] sm:$0xff]   ;;  %v766_v20 = vld [vmem:[%s993_s1 + $0x68] sm:$0xff]  }
   0x6   :  { %678 = vmatprep.subr.bf16.mxu1 %v751_v5  ;;  %v759_v13 = vld [vmem:[%s993_s1 + $0xd8] sm:$0xff]   ;;  %v763_v17 = vld [vmem:[%s993_s1 + $0xe0] sm:$0xff]   ;;  %v767_v21 = vld [vmem:[%s993_s1 + $0xe8] sm:$0xff]  }
   0x7   :  { %v760_v14 = vld [vmem:[%s993_s1 + $0x18] sm:$0xff]   ;;  %v764_v18 = vld [vmem:[%s993_s1 + $0x20] sm:$0xff]   ;;  %v768_v22 = vld [vmem:[%s993_s1 + $0x28] sm:$0xff]  }
   0x8   :  { %657 = vmatpush3.bf16.msra.mxu0 %v752_v6  ;;  %v761_v15 = vld [vmem:[%s993_s1 + $0x98] sm:$0xff]   ;;  %v765_v19 = vld [vmem:[%s993_s1 + $0xa0] sm:$0xff]   ;;  %v769_v23 = vld [vmem:[%s993_s1 + $0xa8] sm:$0xff]  }
   0x9   :  { %679 = vmatpush3.bf16.msra.mxu1 %v753_v7  ;;  %658 = vmatprep.subr.bf16.mxu0 %v754_v8  ;;  %v770_v24 = vld [vmem:[%s993_s1 + $0x70] sm:$0xff]   ;;  %v774_v28 = vld [vmem:[%s993_s1 + $0x78] sm:$0xff]   ;;  %v27_v32 = vld [vmem:[%s994_s0] sm:$0xff] }
   0xa   :  { %680 = vmatprep.subr.bf16.mxu1 %v755_v9  ;;  %v771_v25 = vld [vmem:[%s993_s1 + $0xf0] sm:$0xff]   ;;  %v775_v29 = vld [vmem:[%s993_s1 + $0xf8] sm:$0xff]   ;;  %v28_v33 = vld [vmem:[%s994_s0 + $0x8] sm:$0xff]  ;;  %v603_v34 = vcombine.low %v27_v32, %v27_v32  ;;  %v604_v35 = vcombine.high %v27_v32, %v27_v32 }
   0xb   :  { %v772_v26 = vld [vmem:[%s993_s1 + $0x30] sm:$0xff]   ;;  %v776_v30 = vld [vmem:[%s993_s1 + $0x38] sm:$0xff]   ;;  %v605_v36 = vcombine.low %v28_v33, %v28_v33  ;;  %v606_v37 = vcombine.high %v28_v33, %v28_v33  ;;  %v782_v38 = vld [vmem:[%s995_s3] sm:$0xff]  }
   0xc   :  { %659 = vmatpush3.bf16.msra.mxu0 %v756_v10  ;;  %v773_v27 = vld [vmem:[%s993_s1 + $0xb0] sm:$0xff]   ;;  %v777_v31 = vld [vmem:[%s993_s1 + $0xb8] sm:$0xff]   ;;  %338 = vmatprep.mubr.bf16.mxu0 %v604_v35  ;;  %v783_v40 = vld [vmem:[%s995_s3 + $0x8] sm:$0xff]  }
   0xd   :  { %681 = vmatpush3.bf16.msra.mxu1 %v757_v11  ;;  %660 = vmatprep.subr.bf16.mxu0 %v758_v12  ;;  %v784_v41 = vld [vmem:[%s995_s3 + $0x10] sm:$0xff]   ;;  %v785_v42 = vld [vmem:[%s995_s3 + $0x18] sm:$0xff]   ;;  %v786_v43 = vld [vmem:[%s995_s3 + $0x20] sm:$0xff]  }
   0xe   :  { %682 = vmatprep.subr.bf16.mxu1 %v759_v13  ;;  %378 = vmatprep.mubr.bf16.mxu1 %v606_v37  ;;  %v787_v44 = vld [vmem:[%s995_s3 + $0x28] sm:$0xff]   ;;  %v788_v45 = vld [vmem:[%s995_s3 + $0x30] sm:$0xff]   ;;  %v789_v46 = vld [vmem:[%s995_s3 + $0x38] sm:$0xff]  }
   0xf   :  { %v790_v47 = vld [vmem:[%s996_s5] sm:$0xff]   ;;  %v791_v48 = vld [vmem:[%s996_s5 + $0x8] sm:$0xff]   ;;  %v792_v0 = vld [vmem:[%s996_s5 + $0x10] sm:$0xff]  }
  0x10   :  { %661 = vmatpush3.bf16.msra.mxu0 %v760_v14  ;;  %v602_v51 = vld [vmem:[%s997_s2] ss:$0 sm:$0xff]  ;;  %v793_v1 = vld [vmem:[%s996_s5 + $0x18] sm:$0xff]  }
  0x11   :  { %683 = vmatpush3.bf16.msra.mxu1 %v761_v15  ;;  %662 = vmatprep.subr.bf16.mxu0 %v762_v16  ;;  %v639_v2 = vld [vmem:[%s998_s4] ss:$0 sm:$0xff] }
  0x12   :  { %684 = vmatprep.subr.bf16.mxu1 %v763_v17  ;;  %v648_v10 = vld [vmem:[%s999_s6] ss:$0 sm:$0xff] }
  0x14   :  { %663 = vmatpush3.bf16.msra.mxu0 %v764_v18 }
  0x15   :  { %685 = vmatpush3.bf16.msra.mxu1 %v765_v19  ;;  %664 = vmatprep.subr.bf16.mxu0 %v766_v20 }
  0x16   :  { %686 = vmatprep.subr.bf16.mxu1 %v767_v21 }
  0x18   :  { %665 = vmatpush3.bf16.msra.mxu0 %v768_v22 }
  0x19   :  { %687 = vmatpush3.bf16.msra.mxu1 %v769_v23  ;;  %666 = vmatprep.subr.bf16.mxu0 %v770_v24 }
  0x1a   :  { %688 = vmatprep.subr.bf16.mxu1 %v771_v25 }
  0x1c   :  { %667 = vmatpush3.bf16.msra.mxu0 %v772_v26 }
  0x1d   :  { %689 = vmatpush3.bf16.msra.mxu1 %v773_v27  ;;  %668 = vmatprep.subr.bf16.mxu0 %v774_v28 }
  0x1e   :  { %690 = vmatprep.subr.bf16.mxu1 %v775_v29 }
  0x20   :  { %669 = vmatpush3.bf16.msra.mxu0 %v776_v30 }
  0x21   :  { %691 = vmatpush3.bf16.msra.mxu1 %v777_v31  ;;  %712 = vmatprep.subr.bf16.mxu0 %v798_v39 }
  0x22   :  { %732 = vmatprep.subr.bf16.mxu1 %v798_v39 }
  0x23   :  { %339 = vmatmul.mubr.bf16.vlgmr.msra.gmra.mrb[0].mxu0 %v603_v34 }
  0x24   :  { %379 = vmatmul.mubr.bf16.vlgmr.msra.gmra.mrb[0].mxu1 %v605_v36  ;;  %713 = vmatpush3.bf16.msra.mxu0 %v782_v38 }
  0x25   :  { %714 = vmatprep.subr.bf16.mxu0 %v798_v39  ;;  %728 = vmatprep.mubr.msk.bf16.mxu0 %vm799_vm0, %v798_v39 }
  0x26   :  { %740 = vmatprep.mubr.msk.bf16.mxu1 %vm799_vm0, %v798_v39  ;;  %733 = vmatpush3.bf16.msra.mxu1 %v790_v47 }
  0x27   :  { %734 = vmatprep.subr.bf16.mxu1 %v798_v39 }
  0x28   :  { %715 = vmatpush3.bf16.msra.mxu0 %v783_v40 }
  0x29   :  { %716 = vmatprep.subr.bf16.mxu0 %v798_v39 }
  0x2a   :  { %735 = vmatpush3.bf16.msra.mxu1 %v791_v48 }
  0x2b   :  { %736 = vmatprep.subr.bf16.mxu1 %v798_v39 }
  0x2c   :  { %717 = vmatpush3.bf16.msra.mxu0 %v784_v41 }
  0x2d   :  { %718 = vmatprep.subr.bf16.mxu0 %v798_v39 }
  0x2e   :  { %737 = vmatpush3.bf16.msra.mxu1 %v792_v0 }
  0x2f   :  { %738 = vmatprep.subr.bf16.mxu1 %v798_v39 }
  0x30   :  { %719 = vmatpush3.bf16.msra.mxu0 %v785_v42 }
  0x31   :  { %720 = vmatprep.subr.bf16.mxu0 %v798_v39 }
  0x32   :  { %739 = vmatpush3.bf16.msra.mxu1 %v793_v1 }
  0x34   :  { %721 = vmatpush3.bf16.msra.mxu0 %v786_v43 }
  0x35   :  { %722 = vmatprep.subr.bf16.mxu0 %v798_v39 }
  0x38   :  { %723 = vmatpush3.bf16.msra.mxu0 %v787_v44 }
  0x39   :  { %724 = vmatprep.subr.bf16.mxu0 %v798_v39 }
  0x3c   :  { %725 = vmatpush3.bf16.msra.mxu0 %v788_v45 }
  0x3d   :  { %726 = vmatprep.subr.bf16.mxu0 %v798_v39 }
  0x40   :  { %727 = vmatpush3.bf16.msra.mxu0 %v789_v46 }
  0xf6   :  { %v670_v49 = vpop.f32.mrb[0].mxu0 }
  0xf7   :  { %v692_v50 = vpop.f32.mrb[0].mxu1  ;;  %v671_v52 = vpop.f32.mrb[1].mxu0 }
  0xf8   :  { %v693_v53 = vpop.f32.mrb[1].mxu1  ;;  %v672_v54 = vadd.f32 %v671_v52, %v670_v49  ;;  %v673_v56 = vpop.f32.mrb[2].mxu0 }
  0xf9   :  { %v694_v55 = vadd.f32 %v693_v53, %v692_v50  ;;  %v695_v57 = vpop.f32.mrb[2].mxu1  ;;  %v674_v58 = vpop.f32.mrb[3].mxu0 }
  0xfa   :  { %v696_v59 = vpop.f32.mrb[3].mxu1  ;;  %v341_v60 = vadd.f32 %v672_v54, %v602_v51 }
  0xfc   :  { %v381_v61 = vadd.f32 %v694_v55, %v341_v60 }
  0xfe   :  { %v386_v62 = vmax.f32 %v381_v61, 0.0 }
 0x100   :  { %v404_v63 = vpack.c.bf16 %v386_v62, %v386_v62 }
 0x102   :  { %729 = vmatmul.mubr.bf16.vlgmr.msra.gmra.mrb[4].mxu0 %v404_v63 }
 0x1d5   :  { %v493_v3 = vpop.f32.mrb[4].mxu0 }
 0x1d6   :  { %v494_v4 = vadd.f32 %v639_v2, %v493_v3  ;;  %v730_v5 = vpop.f32.mrb[5].mxu0 }
 0x1d7   :  { %v496_v6 = vpop.f32.mrb[6].mxu0 }
 0x1d8   :  { %v499_v7 = vmax.f32 %v494_v4, 0.0  ;;  %v731_v8 = vpop.f32.mrb[7].mxu0 }
 0x1da   :  { %v509_v9 = vpack.c.bf16 %v499_v7, %v499_v7 }
 0x1dc   :  { %741 = vmatmul.mubr.msk.bf16.vlgmr.msra.gmra.mrb[4].mxu1 %vm540_vm1, %v509_v9 }
 0x2af   :  { %v578_v11 = vpop.f32.mrb[4].mxu1 }
 0x2b0   :  { %v579_v12 = vadd.f32 %v648_v10, %v578_v11  ;;  %v742_v13 = vpop.f32.mrb[5].mxu1 }
 0x2b1   :  { %v581_v14 = vpop.f32.mrb[6].mxu1 }
 0x2b2   :  { %v743_v15 = vpop.f32.mrb[7].mxu1  ;;  %v585_v16 = vsel %vm584_vm2, %v579_v12, -inf }
 0x2b3   :  { %586 = vmax.xlane.f32.xlu0 %v585_v16 }
 0x340   :  { %v587_v17 = vpop.xlane.xlu0 %586 }
 0x341   :  { %v588_v18 = vsub.f32 %v579_v12, %v587_v17 }
 0x343   :  { %v589_v19 = vmul.f32 1.442695, %v588_v18 }
 0x345   :  { %794 = vpow2.f32 %v589_v19 }
 0x34f   :  { %v795_v20 = vpop.eup %794 }
 0x350   :  { %v591_v21 = vsel %vm584_vm2, %v795_v20, 0.0 }
 0x351   :  { %592 = vadd.xlane.f32.xlu0 %v591_v21 }
 0x3de   :  { %v593_v22 = vpop.xlane.xlu0 %592 }
 0x3df   :  { %796 = vlog2.f32 %v593_v22 }
 0x3e9   :  { %v797_v23 = vpop.eup %796 }
 0x3ea   :  { %v595_v24 = vmul.f32 0.6931472, %v797_v23 }
 0x3ec   :  { %v596_v25 = vsub.f32 %v588_v18, %v595_v24 }
 0x3ee   :  { %597 = vst.msk [vmem:[%s1000_s7] sm:$0xff] %vm584_vm2, %v596_v25 }

</bundles_post_ra>
